<compile_context>
chip_gen: v7x
topology: tpu7x:2x2x1
jax: 0.10.0
libtpu: 0.0.40
codegen_flags: <defaults>
</compile_context>

<pallas_src>
import functools

import jax
import jax.numpy as jnp
from jax.experimental import pallas as pl
from jax.experimental.pallas import tpu as pltpu


def _pick_layer_block(num_layers, max_kl=25):
    """Layers per grid step: as large as possible (<= max_kl) but keep >= 2 grid
    steps so the next step's weight DMA overlaps the current step's compute."""
    return max(1, min(max_kl, (num_layers + 1) // 2))


def mlp_kernel(x_ref, w_ref, gb_ref, o_ref, ssq_ref, *,
               use_bn, kl, num_layers, eps=1e-5):
    g = pl.program_id(0)

    # Grid step 0: seed the carried activation (output block, VMEM-resident
    # across the whole grid) with the input.
    @pl.when(g == 0)
    def _():
        o_ref[...] = x_ref[...]

    x = o_ref[...]                               # (B, N) f32 current activation
    n_elems = x.shape[0] * x.shape[1]

    # KL layers per grid step, statically unrolled.
    for i in range(kl):
        layer = g * kl + i                       # dynamic global layer index
        w = w_ref[i]                             # (N, N) bf16, (in, out) layout

        # Linear (no bias): plain x @ W on the MXU, f32 accumulation.
        h = jax.lax.dot_general(
            x.astype(w.dtype), w,
            (((1,), (0,)), ((), ())),
            preferred_element_type=jnp.float32,
        )

        if use_bn:
            # BatchNorm1d training mode: biased batch stats over the batch dim,
            # gamma folded into the normalization scale.
            gb = gb_ref[layer]                   # (2, N): gamma row 0, beta row 1
            gamma = gb[0:1, :]
            beta = gb[1:2, :]
            mean = jnp.mean(h, axis=0, keepdims=True)
            var = jnp.mean(h * h, axis=0, keepdims=True) - mean * mean
            scale = gamma * jax.lax.rsqrt(var + eps)
            h = h * scale + (beta - mean * scale)

        h = jnp.maximum(h, 0.0)                  # ReLU

        # Tail guard for non-divisor L: padded layers leave the activation
        # unchanged (their diagnostics are sliced away in the wrapper).
        h = jnp.where(layer < num_layers, h, x)

        # torch.std() diagnostic: centered sum of squares only (two-pass, no
        # cancellation); sqrt / (n-1) finalization happens in the wrapper so no
        # scalar math sits on the serial layer chain.
        mu = jnp.sum(h) * (1.0 / n_elems)
        d = h - mu
        ssq_ref[layer] = jnp.sum(d * d)
        # TODO(synk): the PyTorch forward prints each layer's std and breaks
        # early on NaN; data-dependent host-side break has no in-kernel
        # equivalent, so per-layer stats are returned and inspected outside.

        x = h

    o_ref[...] = x


def mlp_forward(x, weights, gammas, betas, *, use_bn):
    """x: (B, N) f32; weights: (L, N, N) PyTorch (out,in) layout; gammas/betas: (L, N)."""
    B, N = x.shape
    L = weights.shape[0]
    kl = _pick_layer_block(L)
    num_steps = -(-L // kl)
    L_pad = num_steps * kl

    # One-time HBM-side prep (XLA ops, free at kernel time):
    #  (out,in) -> (in,out) so the kernel does a non-transposed MXU matmul,
    #  bf16 cast to halve weight-streaming bytes (f32 accumulate in-kernel).
    w_t = jnp.transpose(weights, (0, 2, 1)).astype(jnp.bfloat16)
    gb = jnp.stack([gammas, betas], axis=1).astype(jnp.float32)     # (L, 2, N)
    if L_pad != L:
        w_t = jnp.pad(w_t, ((0, L_pad - L), (0, 0), (0, 0)))
        gb = jnp.pad(gb, ((0, L_pad - L), (0, 0), (0, 0)))

    out, ssq = pl.pallas_call(
        functools.partial(mlp_kernel, use_bn=use_bn, kl=kl, num_layers=L),
        out_shape=(
            jax.ShapeDtypeStruct((B, N), jnp.float32),
            jax.ShapeDtypeStruct((L_pad,), jnp.float32),
        ),
        grid_spec=pltpu.PrefetchScalarGridSpec(
            num_scalar_prefetch=0,
            grid=(num_steps,),
            in_specs=[
                pl.BlockSpec((B, N), lambda g: (0, 0)),            # x (resident)
                pl.BlockSpec((kl, N, N), lambda g: (g, 0, 0)),     # KL weights / step
                pl.BlockSpec((L_pad, 2, N), lambda g: (0, 0, 0)),  # all gamma/beta, once
            ],
            out_specs=(
                pl.BlockSpec((B, N), lambda g: (0, 0)),            # carried activation
                pl.BlockSpec(memory_space=pltpu.MemorySpace.SMEM), # per-layer ssq
            ),
        ),
        compiler_params=pltpu.CompilerParams(
            dimension_semantics=("arbitrary",),  # sequential: layers carry state
        ),
    )(x, w_t, gb)

    n = B * N
    stds = jnp.sqrt(ssq[:L] / (n - 1))           # torch.std(): unbiased, all elems
    return out, stds


if __name__ == "__main__":
    neural_num = 256   # as in the module
    layers = 13        # small, non-divisor layer count: exercises the tail-pad path
    batch = 8

    key = jax.random.PRNGKey(0)
    kx, kw = jax.random.split(key)

    x = jax.random.normal(kx, (batch, neural_num), dtype=jnp.float32)

    # initialize(method='normal'): weight ~ N(0, 1); BN affine: gamma=1, beta=0.
    w_normal = jax.random.normal(
        kw, (layers, neural_num, neural_num), dtype=jnp.float32
    )
    gammas = jnp.ones((layers, neural_num), dtype=jnp.float32)
    betas = jnp.zeros((layers, neural_num), dtype=jnp.float32)

    # --- forward(x, use_bn=True) with normal init (stable thanks to BN) ---
    out_bn, stds_bn = mlp_forward(x, w_normal, gammas, betas, use_bn=True)
    out_bn, stds_bn = jax.block_until_ready((out_bn, stds_bn))
    for i, s in enumerate(jax.device_get(stds_bn), 1):
        print(f"layer {i}: std {float(s)}")

    # --- forward(x, use_bn=False) with kaiming_normal_ init (std = sqrt(2/fan_in)) ---
    w_kaiming = w_normal * jnp.sqrt(2.0 / neural_num)
    out_nobn, stds_nobn = mlp_forward(x, w_kaiming, gammas, betas, use_bn=False)
    out_nobn, stds_nobn = jax.block_until_ready((out_nobn, stds_nobn))
    for i, s in enumerate(jax.device_get(stds_nobn), 1):
        print(f"layer {i}: std {float(s)}")

    assert out_bn.shape == (batch, neural_num)
    assert out_nobn.shape == (batch, neural_num)
    assert stds_bn.shape == (layers,) and stds_nobn.shape == (layers,)
    assert bool(jnp.all(jnp.isfinite(out_bn)))
    assert bool(jnp.all(jnp.isfinite(out_nobn)))
    assert bool(jnp.all(jnp.isfinite(stds_bn)))
    assert bool(jnp.all(jnp.isfinite(stds_nobn)))
    print("KERNEL_OK")
</pallas_src>

<mosaic_0001>
module attributes {stable_mosaic.version = 11 : i64} {
  func.func @mlp_kernel(%arg0: i32, %arg1: memref<8x256xf32, #tpu.memory_space<vmem>>, %arg2: memref<7x256x256xbf16, #tpu.memory_space<vmem>>, %arg3: memref<14x2x256xf32, #tpu.memory_space<vmem>>, %arg4: memref<8x256xf32, #tpu.memory_space<vmem>>, %arg5: memref<14xf32, #tpu.memory_space<smem>>) attributes {dimension_semantics = [#tpu.dimension_semantics<arbitrary>], iteration_bounds = array<i64: 2>, scalar_prefetch = 0 : i64, scratch_operands = 0 : i64, tpu.core_type = #tpu.core_type<tc>, window_params = [{pipeline_mode = #tpu.pipeline_mode<synchronous>, transform_indices = @transform_0, window_bounds = array<i64: 8, 256>}, {transform_indices = @transform_1, window_bounds = array<i64: 7, 256, 256>}, {pipeline_mode = #tpu.pipeline_mode<synchronous>, transform_indices = @transform_2, window_bounds = array<i64: 14, 2, 256>}, {pipeline_mode = #tpu.pipeline_mode<synchronous>, transform_indices = @transform_3, window_bounds = array<i64: 8, 256>}, {transform_indices = @transform_4, window_bounds = array<i64: 14>}]} {
    %c0_i32 = arith.constant 0 : i32
    %0 = arith.cmpi eq, %arg0, %c0_i32 : i32
    %1 = arith.extui %0 : i1 to i32
    %c0_i32_0 = arith.constant 0 : i32
    %2 = arith.cmpi ne, %1, %c0_i32_0 : i32
    scf.if %2 {
      %c0_115 = arith.constant 0 : index
      %c0_116 = arith.constant 0 : index
      %355 = vector.load %arg1[%c0_115, %c0_116] : memref<8x256xf32, #tpu.memory_space<vmem>>, vector<8x256xf32>
      %c0_117 = arith.constant 0 : index
      %c0_118 = arith.constant 0 : index
      %356 = vector.load %arg4[%c0_117, %c0_118] : memref<8x256xf32, #tpu.memory_space<vmem>>, vector<8x256xf32>
      tpu.vector_store %arg4[%c0_117, %c0_118], %355 {strides = array<i32>} : memref<8x256xf32, #tpu.memory_space<vmem>>, vector<8x256xf32>,
    } else {
    }
    %c0 = arith.constant 0 : index
    %c0_1 = arith.constant 0 : index
    %3 = vector.load %arg4[%c0, %c0_1] : memref<8x256xf32, #tpu.memory_space<vmem>>, vector<8x256xf32>
    %c7_i32 = arith.constant 7 : i32
    %4 = arith.muli %arg0, %c7_i32 : i32
    %c0_i32_2 = arith.constant 0 : i32
    %5 = arith.addi %4, %c0_i32_2 : i32
    %c0_3 = arith.constant 0 : index
    %c0_4 = arith.constant 0 : index
    %c0_5 = arith.constant 0 : index
    %6 = vector.load %arg2[%c0_3, %c0_4, %c0_5] : memref<7x256x256xbf16, #tpu.memory_space<vmem>>, vector<1x256x256xbf16>
    %7 = vector.shape_cast %6 : vector<1x256x256xbf16> to vector<256x256xbf16>
    %8 = arith.truncf %3 : vector<8x256xf32> to vector<8x256xbf16>
    %cst = arith.constant dense<0.000000e+00> : vector<8x256xf32>
    %9 = tpu.matmul %8, %7, %cst {dimension_numbers = #tpu.dot_dimension_numbers<[1], [0], [0], [1], [0, 0, 1, 1], [], []>} : vector<8x256xbf16>, vector<256x256xbf16>, vector<8x256xf32> -> vector<8x256xf32>
    %10 = arith.index_cast %5 : i32 to index
    %c0_6 = arith.constant 0 : index
    %c0_7 = arith.constant 0 : index
    %11 = vector.load %arg3[%10, %c0_6, %c0_7] : memref<14x2x256xf32, #tpu.memory_space<vmem>>, vector<1x2x256xf32>
    %12 = vector.shape_cast %11 : vector<1x2x256xf32> to vector<2x256xf32>
    %13 = vector.extract_strided_slice %12 {offsets = [0, 0], sizes = [1, 256], strides = [1, 1]} : vector<2x256xf32> to vector<1x256xf32>
    %14 = vector.extract_strided_slice %12 {offsets = [1, 0], sizes = [1, 256], strides = [1, 1]} : vector<2x256xf32> to vector<1x256xf32>
    %cst_8 = arith.constant dense<0.000000e+00> : vector<256xf32>
    %15 = vector.multi_reduction <add>, %9, %cst_8 [0] : vector<8x256xf32> to vector<256xf32>
    %16 = vector.shape_cast %15 : vector<256xf32> to vector<1x256xf32>
    %cst_9 = arith.constant 8.000000e+00 : f32
    %17 = vector.broadcast %cst_9 : f32 to vector<1x256xf32>
    %18 = arith.divf %16, %17 : vector<1x256xf32>
    %19 = arith.mulf %9, %9 : vector<8x256xf32>
    %cst_10 = arith.constant dense<0.000000e+00> : vector<256xf32>
    %20 = vector.multi_reduction <add>, %19, %cst_10 [0] : vector<8x256xf32> to vector<256xf32>
    %21 = vector.shape_cast %20 : vector<256xf32> to vector<1x256xf32>
    %cst_11 = arith.constant 8.000000e+00 : f32
    %22 = vector.broadcast %cst_11 : f32 to vector<1x256xf32>
    %23 = arith.divf %21, %22 : vector<1x256xf32>
    %24 = arith.mulf %18, %18 : vector<1x256xf32>
    %25 = arith.subf %23, %24 : vector<1x256xf32>
    %cst_12 = arith.constant 9.99999974E-6 : f32
    %26 = vector.broadcast %cst_12 : f32 to vector<1x256xf32>
    %27 = arith.addf %25, %26 : vector<1x256xf32>
    %28 = math.rsqrt %27 : vector<1x256xf32>
    %29 = arith.mulf %13, %28 : vector<1x256xf32>
    %30 = vector.broadcast %29 : vector<1x256xf32> to vector<8x256xf32>
    %31 = arith.mulf %9, %30 : vector<8x256xf32>
    %32 = arith.mulf %18, %29 : vector<1x256xf32>
    %33 = arith.subf %14, %32 : vector<1x256xf32>
    %34 = vector.broadcast %33 : vector<1x256xf32> to vector<8x256xf32>
    %35 = arith.addf %31, %34 : vector<8x256xf32>
    %cst_13 = arith.constant 0.000000e+00 : f32
    %36 = vector.broadcast %cst_13 : f32 to vector<8x256xf32>
    %37 = arith.maximumf %35, %36 : vector<8x256xf32>
    %c13_i32 = arith.constant 13 : i32
    %38 = arith.cmpi slt, %5, %c13_i32 : i32
    %39 = arith.select %38, %37, %3 : vector<8x256xf32>
    %40 = vector.shape_cast %39 : vector<8x256xf32> to vector<1x8x256xf32>
    %cst_14 = arith.constant dense<0.000000e+00> : vector<1xf32>
    %41 = vector.multi_reduction <add>, %40, %cst_14 [1, 2] : vector<1x8x256xf32> to vector<1xf32>
    %42 = vector.shape_cast %41 : vector<1xf32> to vector<1x1x1xf32>
    %43 = vector.extract %42[0, 0, 0] : f32 from vector<1x1x1xf32>
    %cst_15 = arith.constant 4.8828125E-4 : f32
    %44 = arith.mulf %43, %cst_15 : f32
    %45 = vector.broadcast %44 : f32 to vector<8x256xf32>
    %46 = arith.subf %39, %45 : vector<8x256xf32>
    %47 = arith.mulf %46, %46 : vector<8x256xf32>
    %48 = vector.shape_cast %47 : vector<8x256xf32> to vector<1x8x256xf32>
    %cst_16 = arith.constant dense<0.000000e+00> : vector<1xf32>
    %49 = vector.multi_reduction <add>, %48, %cst_16 [1, 2] : vector<1x8x256xf32> to vector<1xf32>
    %50 = vector.shape_cast %49 : vector<1xf32> to vector<1x1x1xf32>
    %51 = vector.extract %50[0, 0, 0] : f32 from vector<1x1x1xf32>
    %52 = arith.index_cast %5 : i32 to index
    %53 = memref.load %arg5[%52] : memref<14xf32, #tpu.memory_space<smem>>
    memref.store %51, %arg5[%52] : memref<14xf32, #tpu.memory_space<smem>>
    %c7_i32_17 = arith.constant 7 : i32
    %54 = arith.muli %arg0, %c7_i32_17 : i32
    %c1_i32 = arith.constant 1 : i32
    %55 = arith.addi %54, %c1_i32 : i32
    %c1 = arith.constant 1 : index
    %c0_18 = arith.constant 0 : index
    %c0_19 = arith.constant 0 : index
    %56 = vector.load %arg2[%c1, %c0_18, %c0_19] : memref<7x256x256xbf16, #tpu.memory_space<vmem>>, vector<1x256x256xbf16>
    %57 = vector.shape_cast %56 : vector<1x256x256xbf16> to vector<256x256xbf16>
    %58 = arith.truncf %39 : vector<8x256xf32> to vector<8x256xbf16>
    %cst_20 = arith.constant dense<0.000000e+00> : vector<8x256xf32>
    %59 = tpu.matmul %58, %57, %cst_20 {dimension_numbers = #tpu.dot_dimension_numbers<[1], [0], [0], [1], [0, 0, 1, 1], [], []>} : vector<8x256xbf16>, vector<256x256xbf16>, vector<8x256xf32> -> vector<8x256xf32>
    %60 = arith.index_cast %55 : i32 to index
    %c0_21 = arith.constant 0 : index
    %c0_22 = arith.constant 0 : index
    %61 = vector.load %arg3[%60, %c0_21, %c0_22] : memref<14x2x256xf32, #tpu.memory_space<vmem>>, vector<1x2x256xf32>
    %62 = vector.shape_cast %61 : vector<1x2x256xf32> to vector<2x256xf32>
    %63 = vector.extract_strided_slice %62 {offsets = [0, 0], sizes = [1, 256], strides = [1, 1]} : vector<2x256xf32> to vector<1x256xf32>
    %64 = vector.extract_strided_slice %62 {offsets = [1, 0], sizes = [1, 256], strides = [1, 1]} : vector<2x256xf32> to vector<1x256xf32>
    %cst_23 = arith.constant dense<0.000000e+00> : vector<256xf32>
    %65 = vector.multi_reduction <add>, %59, %cst_23 [0] : vector<8x256xf32> to vector<256xf32>
    %66 = vector.shape_cast %65 : vector<256xf32> to vector<1x256xf32>
    %cst_24 = arith.constant 8.000000e+00 : f32
    %67 = vector.broadcast %cst_24 : f32 to vector<1x256xf32>
    %68 = arith.divf %66, %67 : vector<1x256xf32>
    %69 = arith.mulf %59, %59 : vector<8x256xf32>
    %cst_25 = arith.constant dense<0.000000e+00> : vector<256xf32>
    %70 = vector.multi_reduction <add>, %69, %cst_25 [0] : vector<8x256xf32> to vector<256xf32>
    %71 = vector.shape_cast %70 : vector<256xf32> to vector<1x256xf32>
    %cst_26 = arith.constant 8.000000e+00 : f32
    %72 = vector.broadcast %cst_26 : f32 to vector<1x256xf32>
    %73 = arith.divf %71, %72 : vector<1x256xf32>
    %74 = arith.mulf %68, %68 : vector<1x256xf32>
    %75 = arith.subf %73, %74 : vector<1x256xf32>
    %cst_27 = arith.constant 9.99999974E-6 : f32
    %76 = vector.broadcast %cst_27 : f32 to vector<1x256xf32>
    %77 = arith.addf %75, %76 : vector<1x256xf32>
    %78 = math.rsqrt %77 : vector<1x256xf32>
    %79 = arith.mulf %63, %78 : vector<1x256xf32>
    %80 = vector.broadcast %79 : vector<1x256xf32> to vector<8x256xf32>
    %81 = arith.mulf %59, %80 : vector<8x256xf32>
    %82 = arith.mulf %68, %79 : vector<1x256xf32>
    %83 = arith.subf %64, %82 : vector<1x256xf32>
    %84 = vector.broadcast %83 : vector<1x256xf32> to vector<8x256xf32>
    %85 = arith.addf %81, %84 : vector<8x256xf32>
    %cst_28 = arith.constant 0.000000e+00 : f32
    %86 = vector.broadcast %cst_28 : f32 to vector<8x256xf32>
    %87 = arith.maximumf %85, %86 : vector<8x256xf32>
    %c13_i32_29 = arith.constant 13 : i32
    %88 = arith.cmpi slt, %55, %c13_i32_29 : i32
    %89 = arith.select %88, %87, %39 : vector<8x256xf32>
    %90 = vector.shape_cast %89 : vector<8x256xf32> to vector<1x8x256xf32>
    %cst_30 = arith.constant dense<0.000000e+00> : vector<1xf32>
    %91 = vector.multi_reduction <add>, %90, %cst_30 [1, 2] : vector<1x8x256xf32> to vector<1xf32>
    %92 = vector.shape_cast %91 : vector<1xf32> to vector<1x1x1xf32>
    %93 = vector.extract %92[0, 0, 0] : f32 from vector<1x1x1xf32>
    %cst_31 = arith.constant 4.8828125E-4 : f32
    %94 = arith.mulf %93, %cst_31 : f32
    %95 = vector.broadcast %94 : f32 to vector<8x256xf32>
    %96 = arith.subf %89, %95 : vector<8x256xf32>
    %97 = arith.mulf %96, %96 : vector<8x256xf32>
    %98 = vector.shape_cast %97 : vector<8x256xf32> to vector<1x8x256xf32>
    %cst_32 = arith.constant dense<0.000000e+00> : vector<1xf32>
    %99 = vector.multi_reduction <add>, %98, %cst_32 [1, 2] : vector<1x8x256xf32> to vector<1xf32>
    %100 = vector.shape_cast %99 : vector<1xf32> to vector<1x1x1xf32>
    %101 = vector.extract %100[0, 0, 0] : f32 from vector<1x1x1xf32>
    %102 = arith.index_cast %55 : i32 to index
    %103 = memref.load %arg5[%102] : memref<14xf32, #tpu.memory_space<smem>>
    memref.store %101, %arg5[%102] : memref<14xf32, #tpu.memory_space<smem>>
    %c7_i32_33 = arith.constant 7 : i32
    %104 = arith.muli %arg0, %c7_i32_33 : i32
    %c2_i32 = arith.constant 2 : i32
    %105 = arith.addi %104, %c2_i32 : i32
    %c2 = arith.constant 2 : index
    %c0_34 = arith.constant 0 : index
    %c0_35 = arith.constant 0 : index
    %106 = vector.load %arg2[%c2, %c0_34, %c0_35] : memref<7x256x256xbf16, #tpu.memory_space<vmem>>, vector<1x256x256xbf16>
    %107 = vector.shape_cast %106 : vector<1x256x256xbf16> to vector<256x256xbf16>
    %108 = arith.truncf %89 : vector<8x256xf32> to vector<8x256xbf16>
    %cst_36 = arith.constant dense<0.000000e+00> : vector<8x256xf32>
    %109 = tpu.matmul %108, %107, %cst_36 {dimension_numbers = #tpu.dot_dimension_numbers<[1], [0], [0], [1], [0, 0, 1, 1], [], []>} : vector<8x256xbf16>, vector<256x256xbf16>, vector<8x256xf32> -> vector<8x256xf32>
    %110 = arith.index_cast %105 : i32 to index
    %c0_37 = arith.constant 0 : index
    %c0_38 = arith.constant 0 : index
    %111 = vector.load %arg3[%110, %c0_37, %c0_38] : memref<14x2x256xf32, #tpu.memory_space<vmem>>, vector<1x2x256xf32>
    %112 = vector.shape_cast %111 : vector<1x2x256xf32> to vector<2x256xf32>
    %113 = vector.extract_strided_slice %112 {offsets = [0, 0], sizes = [1, 256], strides = [1, 1]} : vector<2x256xf32> to vector<1x256xf32>
    %114 = vector.extract_strided_slice %112 {offsets = [1, 0], sizes = [1, 256], strides = [1, 1]} : vector<2x256xf32> to vector<1x256xf32>
    %cst_39 = arith.constant dense<0.000000e+00> : vector<256xf32>
    %115 = vector.multi_reduction <add>, %109, %cst_39 [0] : vector<8x256xf32> to vector<256xf32>
    %116 = vector.shape_cast %115 : vector<256xf32> to vector<1x256xf32>
    %cst_40 = arith.constant 8.000000e+00 : f32
    %117 = vector.broadcast %cst_40 : f32 to vector<1x256xf32>
    %118 = arith.divf %116, %117 : vector<1x256xf32>
    %119 = arith.mulf %109, %109 : vector<8x256xf32>
    %cst_41 = arith.constant dense<0.000000e+00> : vector<256xf32>
    %120 = vector.multi_reduction <add>, %119, %cst_41 [0] : vector<8x256xf32> to vector<256xf32>
    %121 = vector.shape_cast %120 : vector<256xf32> to vector<1x256xf32>
    %cst_42 = arith.constant 8.000000e+00 : f32
    %122 = vector.broadcast %cst_42 : f32 to vector<1x256xf32>
    %123 = arith.divf %121, %122 : vector<1x256xf32>
    %124 = arith.mulf %118, %118 : vector<1x256xf32>
    %125 = arith.subf %123, %124 : vector<1x256xf32>
    %cst_43 = arith.constant 9.99999974E-6 : f32
    %126 = vector.broadcast %cst_43 : f32 to vector<1x256xf32>
    %127 = arith.addf %125, %126 : vector<1x256xf32>
    %128 = math.rsqrt %127 : vector<1x256xf32>
    %129 = arith.mulf %113, %128 : vector<1x256xf32>
    %130 = vector.broadcast %129 : vector<1x256xf32> to vector<8x256xf32>
    %131 = arith.mulf %109, %130 : vector<8x256xf32>
    %132 = arith.mulf %118, %129 : vector<1x256xf32>
    %133 = arith.subf %114, %132 : vector<1x256xf32>
    %134 = vector.broadcast %133 : vector<1x256xf32> to vector<8x256xf32>
    %135 = arith.addf %131, %134 : vector<8x256xf32>
    %cst_44 = arith.constant 0.000000e+00 : f32
    %136 = vector.broadcast %cst_44 : f32 to vector<8x256xf32>
    %137 = arith.maximumf %135, %136 : vector<8x256xf32>
    %c13_i32_45 = arith.constant 13 : i32
    %138 = arith.cmpi slt, %105, %c13_i32_45 : i32
    %139 = arith.select %138, %137, %89 : vector<8x256xf32>
    %140 = vector.shape_cast %139 : vector<8x256xf32> to vector<1x8x256xf32>
    %cst_46 = arith.constant dense<0.000000e+00> : vector<1xf32>
    %141 = vector.multi_reduction <add>, %140, %cst_46 [1, 2] : vector<1x8x256xf32> to vector<1xf32>
    %142 = vector.shape_cast %141 : vector<1xf32> to vector<1x1x1xf32>
    %143 = vector.extract %142[0, 0, 0] : f32 from vector<1x1x1xf32>
    %cst_47 = arith.constant 4.8828125E-4 : f32
    %144 = arith.mulf %143, %cst_47 : f32
    %145 = vector.broadcast %144 : f32 to vector<8x256xf32>
    %146 = arith.subf %139, %145 : vector<8x256xf32>
    %147 = arith.mulf %146, %146 : vector<8x256xf32>
    %148 = vector.shape_cast %147 : vector<8x256xf32> to vector<1x8x256xf32>
    %cst_48 = arith.constant dense<0.000000e+00> : vector<1xf32>
    %149 = vector.multi_reduction <add>, %148, %cst_48 [1, 2] : vector<1x8x256xf32> to vector<1xf32>
    %150 = vector.shape_cast %149 : vector<1xf32> to vector<1x1x1xf32>
    %151 = vector.extract %150[0, 0, 0] : f32 from vector<1x1x1xf32>
    %152 = arith.index_cast %105 : i32 to index
    %153 = memref.load %arg5[%152] : memref<14xf32, #tpu.memory_space<smem>>
    memref.store %151, %arg5[%152] : memref<14xf32, #tpu.memory_space<smem>>
    %c7_i32_49 = arith.constant 7 : i32
    %154 = arith.muli %arg0, %c7_i32_49 : i32
    %c3_i32 = arith.constant 3 : i32
    %155 = arith.addi %154, %c3_i32 : i32
    %c3 = arith.constant 3 : index
    %c0_50 = arith.constant 0 : index
    %c0_51 = arith.constant 0 : index
    %156 = vector.load %arg2[%c3, %c0_50, %c0_51] : memref<7x256x256xbf16, #tpu.memory_space<vmem>>, vector<1x256x256xbf16>
    %157 = vector.shape_cast %156 : vector<1x256x256xbf16> to vector<256x256xbf16>
    %158 = arith.truncf %139 : vector<8x256xf32> to vector<8x256xbf16>
    %cst_52 = arith.constant dense<0.000000e+00> : vector<8x256xf32>
    %159 = tpu.matmul %158, %157, %cst_52 {dimension_numbers = #tpu.dot_dimension_numbers<[1], [0], [0], [1], [0, 0, 1, 1], [], []>} : vector<8x256xbf16>, vector<256x256xbf16>, vector<8x256xf32> -> vector<8x256xf32>
    %160 = arith.index_cast %155 : i32 to index
    %c0_53 = arith.constant 0 : index
    %c0_54 = arith.constant 0 : index
    %161 = vector.load %arg3[%160, %c0_53, %c0_54] : memref<14x2x256xf32, #tpu.memory_space<vmem>>, vector<1x2x256xf32>
    %162 = vector.shape_cast %161 : vector<1x2x256xf32> to vector<2x256xf32>
    %163 = vector.extract_strided_slice %162 {offsets = [0, 0], sizes = [1, 256], strides = [1, 1]} : vector<2x256xf32> to vector<1x256xf32>
    %164 = vector.extract_strided_slice %162 {offsets = [1, 0], sizes = [1, 256], strides = [1, 1]} : vector<2x256xf32> to vector<1x256xf32>
    %cst_55 = arith.constant dense<0.000000e+00> : vector<256xf32>
    %165 = vector.multi_reduction <add>, %159, %cst_55 [0] : vector<8x256xf32> to vector<256xf32>
    %166 = vector.shape_cast %165 : vector<256xf32> to vector<1x256xf32>
    %cst_56 = arith.constant 8.000000e+00 : f32
    %167 = vector.broadcast %cst_56 : f32 to vector<1x256xf32>
    %168 = arith.divf %166, %167 : vector<1x256xf32>
    %169 = arith.mulf %159, %159 : vector<8x256xf32>
    %cst_57 = arith.constant dense<0.000000e+00> : vector<256xf32>
    %170 = vector.multi_reduction <add>, %169, %cst_57 [0] : vector<8x256xf32> to vector<256xf32>
    %171 = vector.shape_cast %170 : vector<256xf32> to vector<1x256xf32>
    %cst_58 = arith.constant 8.000000e+00 : f32
    %172 = vector.broadcast %cst_58 : f32 to vector<1x256xf32>
    %173 = arith.divf %171, %172 : vector<1x256xf32>
    %174 = arith.mulf %168, %168 : vector<1x256xf32>
    %175 = arith.subf %173, %174 : vector<1x256xf32>
    %cst_59 = arith.constant 9.99999974E-6 : f32
    %176 = vector.broadcast %cst_59 : f32 to vector<1x256xf32>
    %177 = arith.addf %175, %176 : vector<1x256xf32>
    %178 = math.rsqrt %177 : vector<1x256xf32>
    %179 = arith.mulf %163, %178 : vector<1x256xf32>
    %180 = vector.broadcast %179 : vector<1x256xf32> to vector<8x256xf32>
    %181 = arith.mulf %159, %180 : vector<8x256xf32>
    %182 = arith.mulf %168, %179 : vector<1x256xf32>
    %183 = arith.subf %164, %182 : vector<1x256xf32>
    %184 = vector.broadcast %183 : vector<1x256xf32> to vector<8x256xf32>
    %185 = arith.addf %181, %184 : vector<8x256xf32>
    %cst_60 = arith.constant 0.000000e+00 : f32
    %186 = vector.broadcast %cst_60 : f32 to vector<8x256xf32>
    %187 = arith.maximumf %185, %186 : vector<8x256xf32>
    %c13_i32_61 = arith.constant 13 : i32
    %188 = arith.cmpi slt, %155, %c13_i32_61 : i32
    %189 = arith.select %188, %187, %139 : vector<8x256xf32>
    %190 = vector.shape_cast %189 : vector<8x256xf32> to vector<1x8x256xf32>
    %cst_62 = arith.constant dense<0.000000e+00> : vector<1xf32>
    %191 = vector.multi_reduction <add>, %190, %cst_62 [1, 2] : vector<1x8x256xf32> to vector<1xf32>
    %192 = vector.shape_cast %191 : vector<1xf32> to vector<1x1x1xf32>
    %193 = vector.extract %192[0, 0, 0] : f32 from vector<1x1x1xf32>
    %cst_63 = arith.constant 4.8828125E-4 : f32
    %194 = arith.mulf %193, %cst_63 : f32
    %195 = vector.broadcast %194 : f32 to vector<8x256xf32>
    %196 = arith.subf %189, %195 : vector<8x256xf32>
    %197 = arith.mulf %196, %196 : vector<8x256xf32>
    %198 = vector.shape_cast %197 : vector<8x256xf32> to vector<1x8x256xf32>
    %cst_64 = arith.constant dense<0.000000e+00> : vector<1xf32>
    %199 = vector.multi_reduction <add>, %198, %cst_64 [1, 2] : vector<1x8x256xf32> to vector<1xf32>
    %200 = vector.shape_cast %199 : vector<1xf32> to vector<1x1x1xf32>
    %201 = vector.extract %200[0, 0, 0] : f32 from vector<1x1x1xf32>
    %202 = arith.index_cast %155 : i32 to index
    %203 = memref.load %arg5[%202] : memref<14xf32, #tpu.memory_space<smem>>
    memref.store %201, %arg5[%202] : memref<14xf32, #tpu.memory_space<smem>>
    %c7_i32_65 = arith.constant 7 : i32
    %204 = arith.muli %arg0, %c7_i32_65 : i32
    %c4_i32 = arith.constant 4 : i32
    %205 = arith.addi %204, %c4_i32 : i32
    %c4 = arith.constant 4 : index
    %c0_66 = arith.constant 0 : index
    %c0_67 = arith.constant 0 : index
    %206 = vector.load %arg2[%c4, %c0_66, %c0_67] : memref<7x256x256xbf16, #tpu.memory_space<vmem>>, vector<1x256x256xbf16>
    %207 = vector.shape_cast %206 : vector<1x256x256xbf16> to vector<256x256xbf16>
    %208 = arith.truncf %189 : vector<8x256xf32> to vector<8x256xbf16>
    %cst_68 = arith.constant dense<0.000000e+00> : vector<8x256xf32>
    %209 = tpu.matmul %208, %207, %cst_68 {dimension_numbers = #tpu.dot_dimension_numbers<[1], [0], [0], [1], [0, 0, 1, 1], [], []>} : vector<8x256xbf16>, vector<256x256xbf16>, vector<8x256xf32> -> vector<8x256xf32>
    %210 = arith.index_cast %205 : i32 to index
    %c0_69 = arith.constant 0 : index
    %c0_70 = arith.constant 0 : index
    %211 = vector.load %arg3[%210, %c0_69, %c0_70] : memref<14x2x256xf32, #tpu.memory_space<vmem>>, vector<1x2x256xf32>
    %212 = vector.shape_cast %211 : vector<1x2x256xf32> to vector<2x256xf32>
    %213 = vector.extract_strided_slice %212 {offsets = [0, 0], sizes = [1, 256], strides = [1, 1]} : vector<2x256xf32> to vector<1x256xf32>
    %214 = vector.extract_strided_slice %212 {offsets = [1, 0], sizes = [1, 256], strides = [1, 1]} : vector<2x256xf32> to vector<1x256xf32>
    %cst_71 = arith.constant dense<0.000000e+00> : vector<256xf32>
    %215 = vector.multi_reduction <add>, %209, %cst_71 [0] : vector<8x256xf32> to vector<256xf32>
    %216 = vector.shape_cast %215 : vector<256xf32> to vector<1x256xf32>
    %cst_72 = arith.constant 8.000000e+00 : f32
    %217 = vector.broadcast %cst_72 : f32 to vector<1x256xf32>
    %218 = arith.divf %216, %217 : vector<1x256xf32>
    %219 = arith.mulf %209, %209 : vector<8x256xf32>
    %cst_73 = arith.constant dense<0.000000e+00> : vector<256xf32>
    %220 = vector.multi_reduction <add>, %219, %cst_73 [0] : vector<8x256xf32> to vector<256xf32>
    %221 = vector.shape_cast %220 : vector<256xf32> to vector<1x256xf32>
    %cst_74 = arith.constant 8.000000e+00 : f32
    %222 = vector.broadcast %cst_74 : f32 to vector<1x256xf32>
    %223 = arith.divf %221, %222 : vector<1x256xf32>
    %224 = arith.mulf %218, %218 : vector<1x256xf32>
    %225 = arith.subf %223, %224 : vector<1x256xf32>
    %cst_75 = arith.constant 9.99999974E-6 : f32
    %226 = vector.broadcast %cst_75 : f32 to vector<1x256xf32>
    %227 = arith.addf %225, %226 : vector<1x256xf32>
    %228 = math.rsqrt %227 : vector<1x256xf32>
    %229 = arith.mulf %213, %228 : vector<1x256xf32>
    %230 = vector.broadcast %229 : vector<1x256xf32> to vector<8x256xf32>
    %231 = arith.mulf %209, %230 : vector<8x256xf32>
    %232 = arith.mulf %218, %229 : vector<1x256xf32>
    %233 = arith.subf %214, %232 : vector<1x256xf32>
    %234 = vector.broadcast %233 : vector<1x256xf32> to vector<8x256xf32>
    %235 = arith.addf %231, %234 : vector<8x256xf32>
    %cst_76 = arith.constant 0.000000e+00 : f32
    %236 = vector.broadcast %cst_76 : f32 to vector<8x256xf32>
    %237 = arith.maximumf %235, %236 : vector<8x256xf32>
    %c13_i32_77 = arith.constant 13 : i32
    %238 = arith.cmpi slt, %205, %c13_i32_77 : i32
    %239 = arith.select %238, %237, %189 : vector<8x256xf32>
    %240 = vector.shape_cast %239 : vector<8x256xf32> to vector<1x8x256xf32>
    %cst_78 = arith.constant dense<0.000000e+00> : vector<1xf32>
    %241 = vector.multi_reduction <add>, %240, %cst_78 [1, 2] : vector<1x8x256xf32> to vector<1xf32>
    %242 = vector.shape_cast %241 : vector<1xf32> to vector<1x1x1xf32>
    %243 = vector.extract %242[0, 0, 0] : f32 from vector<1x1x1xf32>
    %cst_79 = arith.constant 4.8828125E-4 : f32
    %244 = arith.mulf %243, %cst_79 : f32
    %245 = vector.broadcast %244 : f32 to vector<8x256xf32>
    %246 = arith.subf %239, %245 : vector<8x256xf32>
    %247 = arith.mulf %246, %246 : vector<8x256xf32>
    %248 = vector.shape_cast %247 : vector<8x256xf32> to vector<1x8x256xf32>
    %cst_80 = arith.constant dense<0.000000e+00> : vector<1xf32>
    %249 = vector.multi_reduction <add>, %248, %cst_80 [1, 2] : vector<1x8x256xf32> to vector<1xf32>
    %250 = vector.shape_cast %249 : vector<1xf32> to vector<1x1x1xf32>
    %251 = vector.extract %250[0, 0, 0] : f32 from vector<1x1x1xf32>
    %252 = arith.index_cast %205 : i32 to index
    %253 = memref.load %arg5[%252] : memref<14xf32, #tpu.memory_space<smem>>
    memref.store %251, %arg5[%252] : memref<14xf32, #tpu.memory_space<smem>>
    %c7_i32_81 = arith.constant 7 : i32
    %254 = arith.muli %arg0, %c7_i32_81 : i32
    %c5_i32 = arith.constant 5 : i32
    %255 = arith.addi %254, %c5_i32 : i32
    %c5 = arith.constant 5 : index
    %c0_82 = arith.constant 0 : index
    %c0_83 = arith.constant 0 : index
    %256 = vector.load %arg2[%c5, %c0_82, %c0_83] : memref<7x256x256xbf16, #tpu.memory_space<vmem>>, vector<1x256x256xbf16>
    %257 = vector.shape_cast %256 : vector<1x256x256xbf16> to vector<256x256xbf16>
    %258 = arith.truncf %239 : vector<8x256xf32> to vector<8x256xbf16>
    %cst_84 = arith.constant dense<0.000000e+00> : vector<8x256xf32>
    %259 = tpu.matmul %258, %257, %cst_84 {dimension_numbers = #tpu.dot_dimension_numbers<[1], [0], [0], [1], [0, 0, 1, 1], [], []>} : vector<8x256xbf16>, vector<256x256xbf16>, vector<8x256xf32> -> vector<8x256xf32>
    %260 = arith.index_cast %255 : i32 to index
    %c0_85 = arith.constant 0 : index
    %c0_86 = arith.constant 0 : index
    %261 = vector.load %arg3[%260, %c0_85, %c0_86] : memref<14x2x256xf32, #tpu.memory_space<vmem>>, vector<1x2x256xf32>
    %262 = vector.shape_cast %261 : vector<1x2x256xf32> to vector<2x256xf32>
    %263 = vector.extract_strided_slice %262 {offsets = [0, 0], sizes = [1, 256], strides = [1, 1]} : vector<2x256xf32> to vector<1x256xf32>
    %264 = vector.extract_strided_slice %262 {offsets = [1, 0], sizes = [1, 256], strides = [1, 1]} : vector<2x256xf32> to vector<1x256xf32>
    %cst_87 = arith.constant dense<0.000000e+00> : vector<256xf32>
    %265 = vector.multi_reduction <add>, %259, %cst_87 [0] : vector<8x256xf32> to vector<256xf32>
    %266 = vector.shape_cast %265 : vector<256xf32> to vector<1x256xf32>
    %cst_88 = arith.constant 8.000000e+00 : f32
    %267 = vector.broadcast %cst_88 : f32 to vector<1x256xf32>
    %268 = arith.divf %266, %267 : vector<1x256xf32>
    %269 = arith.mulf %259, %259 : vector<8x256xf32>
    %cst_89 = arith.constant dense<0.000000e+00> : vector<256xf32>
    %270 = vector.multi_reduction <add>, %269, %cst_89 [0] : vector<8x256xf32> to vector<256xf32>
    %271 = vector.shape_cast %270 : vector<256xf32> to vector<1x256xf32>
    %cst_90 = arith.constant 8.000000e+00 : f32
    %272 = vector.broadcast %cst_90 : f32 to vector<1x256xf32>
    %273 = arith.divf %271, %272 : vector<1x256xf32>
    %274 = arith.mulf %268, %268 : vector<1x256xf32>
    %275 = arith.subf %273, %274 : vector<1x256xf32>
    %cst_91 = arith.constant 9.99999974E-6 : f32
    %276 = vector.broadcast %cst_91 : f32 to vector<1x256xf32>
    %277 = arith.addf %275, %276 : vector<1x256xf32>
    %278 = math.rsqrt %277 : vector<1x256xf32>
    %279 = arith.mulf %263, %278 : vector<1x256xf32>
    %280 = vector.broadcast %279 : vector<1x256xf32> to vector<8x256xf32>
    %281 = arith.mulf %259, %280 : vector<8x256xf32>
    %282 = arith.mulf %268, %279 : vector<1x256xf32>
    %283 = arith.subf %264, %282 : vector<1x256xf32>
    %284 = vector.broadcast %283 : vector<1x256xf32> to vector<8x256xf32>
    %285 = arith.addf %281, %284 : vector<8x256xf32>
    %cst_92 = arith.constant 0.000000e+00 : f32
    %286 = vector.broadcast %cst_92 : f32 to vector<8x256xf32>
    %287 = arith.maximumf %285, %286 : vector<8x256xf32>
    %c13_i32_93 = arith.constant 13 : i32
    %288 = arith.cmpi slt, %255, %c13_i32_93 : i32
    %289 = arith.select %288, %287, %239 : vector<8x256xf32>
    %290 = vector.shape_cast %289 : vector<8x256xf32> to vector<1x8x256xf32>
    %cst_94 = arith.constant dense<0.000000e+00> : vector<1xf32>
    %291 = vector.multi_reduction <add>, %290, %cst_94 [1, 2] : vector<1x8x256xf32> to vector<1xf32>
    %292 = vector.shape_cast %291 : vector<1xf32> to vector<1x1x1xf32>
    %293 = vector.extract %292[0, 0, 0] : f32 from vector<1x1x1xf32>
    %cst_95 = arith.constant 4.8828125E-4 : f32
    %294 = arith.mulf %293, %cst_95 : f32
    %295 = vector.broadcast %294 : f32 to vector<8x256xf32>
    %296 = arith.subf %289, %295 : vector<8x256xf32>
    %297 = arith.mulf %296, %296 : vector<8x256xf32>
    %298 = vector.shape_cast %297 : vector<8x256xf32> to vector<1x8x256xf32>
    %cst_96 = arith.constant dense<0.000000e+00> : vector<1xf32>
    %299 = vector.multi_reduction <add>, %298, %cst_96 [1, 2] : vector<1x8x256xf32> to vector<1xf32>
    %300 = vector.shape_cast %299 : vector<1xf32> to vector<1x1x1xf32>
    %301 = vector.extract %300[0, 0, 0] : f32 from vector<1x1x1xf32>
    %302 = arith.index_cast %255 : i32 to index
    %303 = memref.load %arg5[%302] : memref<14xf32, #tpu.memory_space<smem>>
    memref.store %301, %arg5[%302] : memref<14xf32, #tpu.memory_space<smem>>
    %c7_i32_97 = arith.constant 7 : i32
    %304 = arith.muli %arg0, %c7_i32_97 : i32
    %c6_i32 = arith.constant 6 : i32
    %305 = arith.addi %304, %c6_i32 : i32
    %c6 = arith.constant 6 : index
    %c0_98 = arith.constant 0 : index
    %c0_99 = arith.constant 0 : index
    %306 = vector.load %arg2[%c6, %c0_98, %c0_99] : memref<7x256x256xbf16, #tpu.memory_space<vmem>>, vector<1x256x256xbf16>
    %307 = vector.shape_cast %306 : vector<1x256x256xbf16> to vector<256x256xbf16>
    %308 = arith.truncf %289 : vector<8x256xf32> to vector<8x256xbf16>
    %cst_100 = arith.constant dense<0.000000e+00> : vector<8x256xf32>
    %309 = tpu.matmul %308, %307, %cst_100 {dimension_numbers = #tpu.dot_dimension_numbers<[1], [0], [0], [1], [0, 0, 1, 1], [], []>} : vector<8x256xbf16>, vector<256x256xbf16>, vector<8x256xf32> -> vector<8x256xf32>
    %310 = arith.index_cast %305 : i32 to index
    %c0_101 = arith.constant 0 : index
    %c0_102 = arith.constant 0 : index
    %311 = vector.load %arg3[%310, %c0_101, %c0_102] : memref<14x2x256xf32, #tpu.memory_space<vmem>>, vector<1x2x256xf32>
    %312 = vector.shape_cast %311 : vector<1x2x256xf32> to vector<2x256xf32>
    %313 = vector.extract_strided_slice %312 {offsets = [0, 0], sizes = [1, 256], strides = [1, 1]} : vector<2x256xf32> to vector<1x256xf32>
    %314 = vector.extract_strided_slice %312 {offsets = [1, 0], sizes = [1, 256], strides = [1, 1]} : vector<2x256xf32> to vector<1x256xf32>
    %cst_103 = arith.constant dense<0.000000e+00> : vector<256xf32>
    %315 = vector.multi_reduction <add>, %309, %cst_103 [0] : vector<8x256xf32> to vector<256xf32>
    %316 = vector.shape_cast %315 : vector<256xf32> to vector<1x256xf32>
    %cst_104 = arith.constant 8.000000e+00 : f32
    %317 = vector.broadcast %cst_104 : f32 to vector<1x256xf32>
    %318 = arith.divf %316, %317 : vector<1x256xf32>
    %319 = arith.mulf %309, %309 : vector<8x256xf32>
    %cst_105 = arith.constant dense<0.000000e+00> : vector<256xf32>
    %320 = vector.multi_reduction <add>, %319, %cst_105 [0] : vector<8x256xf32> to vector<256xf32>
    %321 = vector.shape_cast %320 : vector<256xf32> to vector<1x256xf32>
    %cst_106 = arith.constant 8.000000e+00 : f32
    %322 = vector.broadcast %cst_106 : f32 to vector<1x256xf32>
    %323 = arith.divf %321, %322 : vector<1x256xf32>
    %324 = arith.mulf %318, %318 : vector<1x256xf32>
    %325 = arith.subf %323, %324 : vector<1x256xf32>
    %cst_107 = arith.constant 9.99999974E-6 : f32
    %326 = vector.broadcast %cst_107 : f32 to vector<1x256xf32>
    %327 = arith.addf %325, %326 : vector<1x256xf32>
    %328 = math.rsqrt %327 : vector<1x256xf32>
    %329 = arith.mulf %313, %328 : vector<1x256xf32>
    %330 = vector.broadcast %329 : vector<1x256xf32> to vector<8x256xf32>
    %331 = arith.mulf %309, %330 : vector<8x256xf32>
    %332 = arith.mulf %318, %329 : vector<1x256xf32>
    %333 = arith.subf %314, %332 : vector<1x256xf32>
    %334 = vector.broadcast %333 : vector<1x256xf32> to vector<8x256xf32>
    %335 = arith.addf %331, %334 : vector<8x256xf32>
    %cst_108 = arith.constant 0.000000e+00 : f32
    %336 = vector.broadcast %cst_108 : f32 to vector<8x256xf32>
    %337 = arith.maximumf %335, %336 : vector<8x256xf32>
    %c13_i32_109 = arith.constant 13 : i32
    %338 = arith.cmpi slt, %305, %c13_i32_109 : i32
    %339 = arith.select %338, %337, %289 : vector<8x256xf32>
    %340 = vector.shape_cast %339 : vector<8x256xf32> to vector<1x8x256xf32>
    %cst_110 = arith.constant dense<0.000000e+00> : vector<1xf32>
    %341 = vector.multi_reduction <add>, %340, %cst_110 [1, 2] : vector<1x8x256xf32> to vector<1xf32>
    %342 = vector.shape_cast %341 : vector<1xf32> to vector<1x1x1xf32>
    %343 = vector.extract %342[0, 0, 0] : f32 from vector<1x1x1xf32>
    %cst_111 = arith.constant 4.8828125E-4 : f32
    %344 = arith.mulf %343, %cst_111 : f32
    %345 = vector.broadcast %344 : f32 to vector<8x256xf32>
    %346 = arith.subf %339, %345 : vector<8x256xf32>
    %347 = arith.mulf %346, %346 : vector<8x256xf32>
    %348 = vector.shape_cast %347 : vector<8x256xf32> to vector<1x8x256xf32>
    %cst_112 = arith.constant dense<0.000000e+00> : vector<1xf32>
    %349 = vector.multi_reduction <add>, %348, %cst_112 [1, 2] : vector<1x8x256xf32> to vector<1xf32>
    %350 = vector.shape_cast %349 : vector<1xf32> to vector<1x1x1xf32>
    %351 = vector.extract %350[0, 0, 0] : f32 from vector<1x1x1xf32>
    %352 = arith.index_cast %305 : i32 to index
    %353 = memref.load %arg5[%352] : memref<14xf32, #tpu.memory_space<smem>>
    memref.store %351, %arg5[%352] : memref<14xf32, #tpu.memory_space<smem>>
    %c0_113 = arith.constant 0 : index
    %c0_114 = arith.constant 0 : index
    %354 = vector.load %arg4[%c0_113, %c0_114] : memref<8x256xf32, #tpu.memory_space<vmem>>, vector<8x256xf32>
    tpu.vector_store %arg4[%c0_113, %c0_114], %339 {strides = array<i32>} : memref<8x256xf32, #tpu.memory_space<vmem>>, vector<8x256xf32>,
    return
  }
  func.func @transform_0(%arg0: i32) -> (i32, i32) {
    %c0_i32 = arith.constant 0 : i32
    %c0_i32_0 = arith.constant 0 : i32
    %c0_i32_1 = arith.constant 0 : i32
    return %c0_i32, %c0_i32_0 : i32, i32
  }
  func.func @transform_1(%arg0: i32) -> (i32, i32, i32) {
    %c0_i32 = arith.constant 0 : i32
    %c0_i32_0 = arith.constant 0 : i32
    %c0_i32_1 = arith.constant 0 : i32
    return %arg0, %c0_i32, %c0_i32_0 : i32, i32, i32
  }
  func.func @transform_2(%arg0: i32) -> (i32, i32, i32) {
    %c0_i32 = arith.constant 0 : i32
    %c0_i32_0 = arith.constant 0 : i32
    %c0_i32_1 = arith.constant 0 : i32
    %c0_i32_2 = arith.constant 0 : i32
    return %c0_i32, %c0_i32_0, %c0_i32_1 : i32, i32, i32
  }
  func.func @transform_3(%arg0: i32) -> (i32, i32) {
    %c0_i32 = arith.constant 0 : i32
    %c0_i32_0 = arith.constant 0 : i32
    %c0_i32_1 = arith.constant 0 : i32
    return %c0_i32, %c0_i32_0 : i32, i32
  }
  func.func @transform_4(%arg0: i32) -> i32 {
    %c0_i32 = arith.constant 0 : i32
    %c0_i32_0 = arith.constant 0 : i32
    return %c0_i32 : i32
  }
}

</mosaic_0001>

<bundles_post_ra>
// kernel: tpu_custom_call.1
= control target key start
LH: loop header
LB: loop body
LE: loop exit
PB: predicated region body
PF: predicated region fallthrough
CT: control target
= control target key end

     0   :  { %10 = vsyncpa [#allocation3], 0  ;;  %s4872_s0 = inlined_call_operand.hbm [shape: f32[8,256], index: 0, kind: input, shape index: {}]   ;;  %s4873_s1 = inlined_call_operand.hbm [shape: bf16[14,256,256], index: 1, kind: input, shape index: {}]   ;;  %s4874_s2 = inlined_call_operand.hbm [shape: f32[14,2,256], index: 2, kind: input, shape index: {}]   ;;  %s4875_s3 = inlined_call_operand.hbm [shape: f32[8,256], index: 3, kind: output, shape index: {0}]   ;;  %s4876_s4 = inlined_call_operand.hbm [shape: f32[14], index: 4, kind: output, shape index: {1}]  }
   0x1   :  { %11 = vsyncpa [#allocation7], 0 }
   0x2   :  { %13 = vsyncpa [#allocation7 + $0x1], 0 }
   0x3   :  { %14 = vsyncpa [#allocation4], 0 }
   0x4   :  { %15 = vsyncpa [#allocation5], 0  ;;  %s4214_s15 = smov 0   ;;  %s4216_s16 = smov 0  }
   0x5   :  { %s4218_s17 = smov 0   ;;  %s4220_s18 = smov 0  }
   0x6 LB: > { %s4233_s19 = sadd.s32 4294967295, %s4177_s18   ;;  %s4236_s20 = sadd.s32 1, %s4177_s18   ;;  %s4177_s18 = sphi %s4220_s18, %s4897_s18   ;;  %s4173_s17 = sphi %s4218_s17, %s4896_s17   ;;  %s4169_s16 = sphi %s4216_s16, %s4895_s16   ;;  %s4165_s15 = sphi %s4214_s15, %s4894_s15  }
   0x7   : > { %s46_s21 = ssub.s32 %s4177_s18, %s4236_s20  ;;  %s49_s22 = sadd.s32 1, %s4173_s17 }
   0x8   : > { %p47_p0 = scmp.eq.s32.totalorder %s46_s21, 0  ;;  %p56_p1 = scmp.ne.s32.totalorder %s4173_s17, %s4169_s16 }
   0x9   : > { %p57_p2 = scmp.eq.s32.totalorder %s4177_s18, 0  ;;  %p62_p3 = scmp.ne.s32.totalorder %s4169_s16, %s4165_s15 }
   0xa   : > { %s4246_s23 = scalar_select %p47_p0, %s4173_s17, %s49_s22  }
   0xb   : > { %p4248_p4 = por %p57_p2, %p56_p1  ;;  %p4877_p5 = scmp.eq.s32.totalorder %s4233_s19, 0 }
   0xc   : > { %p3080_p6 = scmp.ge.s32.totalorder %s4177_s18, 1  ;;  %p136_p7 = scmp.lt.s32.totalorder %s4177_s18, 3 }
   0xd   : > { %p4257_p8 = por %p4877_p5, %p62_p3  ;;  %s4179_s27 = smov [#allocation8]  }
   0xe   : > { %p4262_p10 = pnand %p3080_p6, %p136_p7  ;;  %s159_s28 = sshll.u32 %s4179_s27, 4  ;;  %s160_s28 = int_to_ptr.vmem [resolvable:$true] %s159_s28 }
   0xf   : > { %s4882_s25 = scalar_select %p4257_p8, 1, 0 }
  0x10   : > { %s4883_s26 = scalar_select %p4262_p10, 1, 0 }
  0x11   : > { %p3578_p11 = pneg %p4262_p10  ;;  %p3591_p13 = scmp.lt.s32.totalorder %s4177_s18, 2 }
  0x12   : > { %s4003_s7 = scalar_lea.hbm %s4874_s2, 896 }
  0x13   : > { %p4270_p12 = pnand %p3578_p11, %p4877_p5  ;;  %p4277_p0 = pnand %p3591_p13, %p4248_p4 }
  0x14   : > { %p4004_p1 = scmp.ne.s32.totalorder %s4874_s2, %s4003_s7  ;;  %p4010_p4 = scmp.lt.u32.totalorder %s4003_s7, %s4874_s2 }
  0x15   : > { %s4885_s30 = scalar_select %p4277_p0, 1, 0 }
  0x16   : > { %p4005_p2 = pneg %p4270_p12 }
  0x18   : > { %p4006_p3 = pnand %p4005_p2, %p4004_p1 }
  0x1a   : > { %p4007_p6 = pneg %p4006_p3 }
  0x1c   : > { %p4012_p7 = pnand %p4010_p4, %p4007_p6 }
  0x1e   : > { %4015 = shalt.err (!%p4012_p7)
}
  0x1f   : > { %s4016_s12 = scalar_lea.vmem %s160_s28, 896  ;;  %p4024_p5 = scmp.lt.s32.totalorder %s160_s28, %s160_s28 }
  0x20   : > { %p4017_p11 = scmp.ne.s32.totalorder %s160_s28, %s4016_s12  ;;  %p4025_p8 = scmp.lt.s32.totalorder %s4016_s12, %s4016_s12 }
  0x22   : > { %p4019_p13 = pnand %p4017_p11, %p4005_p2  ;;  %p4026_p10 = por %p4025_p8, %p4024_p5 }
  0x24   : > { %p4020_p9 = pneg %p4019_p13 }
  0x26   : > { %p4027_p0 = pnand %p4026_p10, %p4020_p9 }
  0x28   : > { %4030 = shalt.err (!%p4027_p0)
}
  0x29   : > { %s4180_s13 = smov 64   ;;  %s4181_s14 = smov 4  }
  0x2a   : > { %3584 = dma.hbm_to_vmem [thread:$0]  (!%p4270_p12), %s4874_s2, 896, %s160_s28, [#allocation7], %s4180_s13, %s4180_s13, %s4181_s14  }
  0x2b   : > { %s4182_s22 = smov [#allocation2]   ;;  %s173_s27 = sand.u32 1, %s4177_s18  }
  0x2c   : > { %s149_s24 = sshll.u32 %s4182_s22, 4  ;;  %s4031_s7 = scalar_lea.hbm %s4872_s0, 256  ;;  %s150_s24 = int_to_ptr.vmem [resolvable:$true] %s149_s24 }
  0x2d   : > { %p4032_p5 = scmp.ne.s32.totalorder %s4872_s0, %s4031_s7  ;;  %p4038_p10 = scmp.lt.u32.totalorder %s4031_s7, %s4872_s0 }
  0x2f   : > { %p4034_p8 = pnand %p4032_p5, %p4005_p2 }
  0x31   : > { %p4035_p9 = pneg %p4034_p8 }
  0x33   : > { %p4040_p0 = pnand %p4038_p10, %p4035_p9 }
  0x35   : > { %4043 = shalt.err (!%p4040_p0)
}
  0x36   : > { %s4044_s28 = scalar_lea.vmem %s150_s24, 256  ;;  %p4052_p4 = scmp.lt.s32.totalorder %s150_s24, %s150_s24 }
  0x37   : > { %p4045_p1 = scmp.ne.s32.totalorder %s150_s24, %s4044_s28  ;;  %p4053_p7 = scmp.lt.s32.totalorder %s4044_s28, %s4044_s28 }
  0x39   : > { %p4047_p3 = pnand %p4045_p1, %p4005_p2  ;;  %p4054_p11 = por %p4053_p7, %p4052_p4 }
  0x3b   : > { %p4048_p6 = pneg %p4047_p3 }
  0x3d   : > { %p4055_p13 = pnand %p4054_p11, %p4048_p6 }
  0x3f   : > { %4058 = shalt.err (!%p4055_p13)
}
  0x40   : > { %3581 = dma.hbm_to_vmem [thread:$0]  (!%p4270_p12), %s4872_s0, 256, %s150_s24, [#allocation3]  }
  0x41   : > { %s175_s14 = sand.u32 1, %s4173_s17   ;;  %s3529_s15 = smul.u32 28672, %s4177_s18 }
  0x42   : > { %s3530_s21 = smul.u32 1792, %s175_s14  ;;  %s4333_s8 = scalar_lea.sflag [#allocation7], %s173_s27 }
  0x43   : > { %s4329_s6 = scalar_lea.hbm %s4873_s1, %s3529_s15  ;;  %p4886_p2 = scmp.ne.s32.totalorder %s4885_s30, 0 }
  0x44   : > { %s177_s29 = scalar_lea.vmem [#allocation6], %s3530_s21  ;;  %s4059_s9 = scalar_lea.hbm %s4329_s6, 28672 }
  0x45   : > { %s185_s7 = sshll.u32 %s177_s29, 4  ;;  %p4060_p12 = scmp.ne.s32.totalorder %s4329_s6, %s4059_s9  ;;  %s4331_s7 = int_to_ptr.vmem [resolvable:$true] %s185_s7 }
  0x46   : > { %p4061_p5 = pneg %p4886_p2  ;;  %s4064_s10 = scalar_lea.hbm %s4873_s1, 57344 }
  0x47   : > { %p4065_p10 = scmp.lt.u32.totalorder %s4329_s6, %s4873_s1  ;;  %p4066_p0 = scmp.lt.u32.totalorder %s4064_s10, %s4059_s9 }
  0x48   : > { %p4062_p8 = pnand %p4061_p5, %p4060_p12  ;;  %p4068_p3 = scmp.lt.u32.totalorder %s4059_s9, %s4329_s6 }
  0x49   : > { %p4067_p1 = por %p4066_p0, %p4065_p10 }
  0x4a   : > { %p4063_p9 = pneg %p4062_p8 }
  0x4b   : > { %p4069_p6 = por %p4068_p3, %p4067_p1 }
  0x4d   : > { %p4070_p4 = pnand %p4069_p6, %p4063_p9 }
  0x4f   : > { %4073 = shalt.err (!%p4070_p4)
}
  0x50   : > { %s4074_s27 = scalar_lea.vmem %s4331_s7, 28672  ;;  %s4183_s12 = smov [#allocation6]  }
  0x51   : > { %p4075_p7 = scmp.ne.s32.totalorder %s4331_s7, %s4074_s27  ;;  %s4079_s13 = sshll.u32 %s4183_s12, 4  ;;  %s4080_s13 = int_to_ptr.vmem [resolvable:$false] %s4079_s13 }
  0x52   : > { %s4081_s14 = scalar_lea.vmem %s4080_s13, 57344  ;;  %p4082_p12 = scmp.lt.s32.totalorder %s4331_s7, %s4080_s13 }
  0x53   : > { %p4077_p11 = pnand %p4075_p7, %p4061_p5  ;;  %p4083_p8 = scmp.lt.s32.totalorder %s4081_s14, %s4074_s27 }
  0x55   : > { %p4078_p13 = pneg %p4077_p11  ;;  %p4084_p10 = por %p4083_p8, %p4082_p12 }
  0x57   : > { %p4085_p0 = pnand %p4084_p10, %p4078_p13 }
  0x59   : > { %4088 = shalt.err (!%p4085_p0)
}
  0x5a   : > { %s4184_s15 = smov 128   ;;  %s4185_s21 = smov 8  }
  0x5b   : > { %3588 = dma.hbm_to_vmem [thread:$0]  (!%p4886_p2), %s4329_s6, 28672, %s4331_s7, %s4333_s8, %s4184_s15, %s4184_s15, %s4185_s21  }
  0x5c   : > { %p4887_p5 = scmp.ne.s32.totalorder %s4883_s26, 0 }
  0x5d   : > { %p4888_p9 = scmp.eq.s32.totalorder (!%p4887_p5), %s4233_s19, 0 }
  0x5e   : > { %197 = sbr.rel (%p4887_p5) target bundleno = 2527 (0x9df), region = 32 }
  0x65   : > { %4144 = dma.done.wait (%p4888_p9), [#allocation3], 256   ;;  %p4889_p1 = pmov %p4888_p9 }
  0x66   : > { %s203_s22 = sand.u32 1, %s4233_s19   ;;  %s205_s5 = sand.u32 1, %s4169_s16  }
  0x67   : > { %4146 = vsyncadd (%p4889_p1), [#allocation3], 4294967040  ;;  %s3531_s29 = smul.u32 1792, %s205_s5  ;;  %s204_s9 = scalar_lea.sflag [#allocation7], %s203_s22 }
  0x68   : > { %p4890_p3 = scmp.ne.s32.totalorder %s4882_s25, 0 }
  0x69   : > { %s4369_s18 = scalar_lea.vmem [#allocation6], %s3531_s29 }
  0x6a   : > { %4148 = dma.done.wait (%p4890_p3), %s204_s9, 28672  }
  0x6b   : > { %4150 = vsyncadd (%p4890_p3), %s204_s9, 4294938624  ;;  %p4891_p2 = pmov %p4889_p1 }
  0x6c   : > { %p4892_p6 = pmov %p4889_p1 }
  0x6d   : > { %4152 = dma.done.wait (%p4891_p2), [#allocation7], 896  }
  0x6e   : > { %4154 = vsyncadd (%p4892_p6), [#allocation7], 4294966400  ;;  %p4893_p4 = scmp.ne.s32.totalorder %s4233_s19, 0 }
  0x6f   : > { %v236_v0 = vld [vmem:[#allocation2] sm:$0xff] (!%p4893_p4)  ;;  %v237_v1 = vld [vmem:[#allocation2 + $0x8] sm:$0xff] (!%p4893_p4) }
  0x70   : > { %235 = sbr.rel (%p4893_p4) target bundleno = 119 (0x77), region = 48  ;;  %238 = vst [vmem:[#allocation9] sm:$0xff] (!%p4893_p4), %v236_v0  ;;  %239 = vst [vmem:[#allocation9 + $0x8] sm:$0xff] (!%p4893_p4), %v237_v1 }
  0x77 PF: > { %v3639_v2 = vld [vmem:[%s4369_s18 + $0x4] ss:$8 sps:$4 sm:$0xff]   ;;  %v3641_v3 = vld [vmem:[%s4369_s18] ss:$8 sps:$4 sm:$0xff]   ;;  %v3642_v4 = vld [vmem:[%s4369_s18 + $0x14] ss:$8 sps:$4 sm:$0xff]  }
  0x78   : > { %437 = vmatprep.subr.bf16.mxu0 %v3639_v2  ;;  %v3644_v5 = vld [vmem:[%s4369_s18 + $0x10] ss:$8 sps:$4 sm:$0xff]   ;;  %v3645_v6 = vld [vmem:[%s4369_s18 + $0x24] ss:$8 sps:$4 sm:$0xff]   ;;  %v3647_v7 = vld [vmem:[%s4369_s18 + $0x20] ss:$8 sps:$4 sm:$0xff]  }
  0x79   : > { %438 = vmatpush1.bf16.msra.mxu0 %v3641_v3  ;;  %v3648_v8 = vld [vmem:[%s4369_s18 + $0x34] ss:$8 sps:$4 sm:$0xff]   ;;  %v3650_v9 = vld [vmem:[%s4369_s18 + $0x30] ss:$8 sps:$4 sm:$0xff]   ;;  %v3651_v10 = vld [vmem:[%s4369_s18 + $0x44] ss:$8 sps:$4 sm:$0xff]  }
  0x7a   : > { %439 = vmatprep.subr.bf16.mxu0 %v3642_v4  ;;  %v3653_v11 = vld [vmem:[%s4369_s18 + $0x40] ss:$8 sps:$4 sm:$0xff]   ;;  %v3654_v12 = vld [vmem:[%s4369_s18 + $0x54] ss:$8 sps:$4 sm:$0xff]   ;;  %v3656_v13 = vld [vmem:[%s4369_s18 + $0x50] ss:$8 sps:$4 sm:$0xff]  }
  0x7b   : > { %v3657_v14 = vld [vmem:[%s4369_s18 + $0x64] ss:$8 sps:$4 sm:$0xff]   ;;  %v3659_v15 = vld [vmem:[%s4369_s18 + $0x60] ss:$8 sps:$4 sm:$0xff]   ;;  %v3660_v17 = vld [vmem:[%s4369_s18 + $0x74] ss:$8 sps:$4 sm:$0xff]  }
  0x7c   : > { %v4395_v16 = vld [vmem:[#allocation9 + $0x8] sm:$0xff]  ;;  %v3662_v20 = vld [vmem:[%s4369_s18 + $0x70] ss:$8 sps:$4 sm:$0xff]   ;;  %v3666_v23 = vld [vmem:[%s4369_s18 + $0x94] ss:$8 sps:$4 sm:$0xff]   ;;  %s3528_s25 = smul.u32 28, %s4233_s19 }
  0x7d   : > { %440 = vmatpush1.bf16.msra.mxu0 %v3644_v5  ;;  %v276_v18 = vpack.c.bf16 %v4395_v16, %v4395_v16  ;;  %v3687_v19 = vld [vmem:[%s4369_s18 + $0x104] ss:$8 sps:$4 sm:$0xff]   ;;  %v3665_v22 = vld [vmem:[%s4369_s18 + $0x80] ss:$8 sps:$4 sm:$0xff]   ;;  %v3668_v24 = vld [vmem:[%s4369_s18 + $0x90] ss:$8 sps:$4 sm:$0xff]  }
  0x7e   : > { %441 = vmatprep.subr.bf16.mxu0 %v3645_v6  ;;  %822 = vmatprep.subr.bf16.mxu1 %v3687_v19  ;;  %v3663_v21 = vld [vmem:[%s4369_s18 + $0x84] ss:$8 sps:$4 sm:$0xff]   ;;  %v3671_v26 = vld [vmem:[%s4369_s18 + $0xa0] ss:$8 sps:$4 sm:$0xff]   ;;  %v3672_v27 = vld [vmem:[%s4369_s18 + $0xb4] ss:$8 sps:$4 sm:$0xff]  }
  0x7f   : > { %469 = vmatprep.mubr.bf16.mxu0 %v276_v18  ;;  %v3669_v25 = vld [vmem:[%s4369_s18 + $0xa4] ss:$8 sps:$4 sm:$0xff]   ;;  %v3674_v28 = vld [vmem:[%s4369_s18 + $0xb0] ss:$8 sps:$4 sm:$0xff]   ;;  %v3677_v30 = vld [vmem:[%s4369_s18 + $0xc0] ss:$8 sps:$4 sm:$0xff]  }
  0x80   : > { %v3675_v29 = vld [vmem:[%s4369_s18 + $0xc4] ss:$8 sps:$4 sm:$0xff]   ;;  %v3678_v31 = vld [vmem:[%s4369_s18 + $0xd4] ss:$8 sps:$4 sm:$0xff]   ;;  %v3680_v32 = vld [vmem:[%s4369_s18 + $0xd0] ss:$8 sps:$4 sm:$0xff]  }
  0x81   : > { %442 = vmatpush1.bf16.msra.mxu0 %v3647_v7  ;;  %v3681_v33 = vld [vmem:[%s4369_s18 + $0xe4] ss:$8 sps:$4 sm:$0xff]   ;;  %v3683_v34 = vld [vmem:[%s4369_s18 + $0xe0] ss:$8 sps:$4 sm:$0xff]   ;;  %v3684_v35 = vld [vmem:[%s4369_s18 + $0xf4] ss:$8 sps:$4 sm:$0xff]  }
  0x82   : > { %443 = vmatprep.subr.bf16.mxu0 %v3648_v8  ;;  %v3686_v36 = vld [vmem:[%s4369_s18 + $0xf0] ss:$8 sps:$4 sm:$0xff]   ;;  %v3689_v39 = vld [vmem:[%s4369_s18 + $0x100] ss:$8 sps:$4 sm:$0xff]   ;;  %v3690_v40 = vld [vmem:[%s4369_s18 + $0x114] ss:$8 sps:$4 sm:$0xff]  }
  0x83   : > { %v4418_v37 = vld [vmem:[#allocation9] sm:$0xff]  ;;  %823 = vmatpush1.bf16.msra.mxu1 %v3689_v39  ;;  %v3693_v42 = vld [vmem:[%s4369_s18 + $0x124] ss:$8 sps:$4 sm:$0xff]   ;;  %v3695_v43 = vld [vmem:[%s4369_s18 + $0x120] ss:$8 sps:$4 sm:$0xff]   ;;  %s4462_s26 = scalar_lea.vmem [#allocation8], %s3528_s25 }
  0x84   : > { %v275_v38 = vpack.c.bf16 %v4418_v37, %v4418_v37  ;;  %v3692_v41 = vld [vmem:[%s4369_s18 + $0x110] ss:$8 sps:$4 sm:$0xff]   ;;  %824 = vmatprep.subr.bf16.mxu1 %v3690_v40  ;;  %v3696_v44 = vld [vmem:[%s4369_s18 + $0x134] ss:$8 sps:$4 sm:$0xff]   ;;  %v3699_v46 = vld [vmem:[%s4369_s18 + $0x144] ss:$8 sps:$4 sm:$0xff]  }
  0x85   : > { %444 = vmatpush1.bf16.msra.mxu0 %v3650_v9  ;;  %v3698_v45 = vld [vmem:[%s4369_s18 + $0x130] ss:$8 sps:$4 sm:$0xff]   ;;  %v3701_v47 = vld [vmem:[%s4369_s18 + $0x140] ss:$8 sps:$4 sm:$0xff]   ;;  %v3702_v48 = vld [vmem:[%s4369_s18 + $0x154] ss:$8 sps:$4 sm:$0xff]  }
  0x86   : > { %445 = vmatprep.subr.bf16.mxu0 %v3651_v10  ;;  %v3704_v49 = vld [vmem:[%s4369_s18 + $0x150] ss:$8 sps:$4 sm:$0xff]   ;;  %v3705_v50 = vld [vmem:[%s4369_s18 + $0x164] ss:$8 sps:$4 sm:$0xff]   ;;  %v3707_v51 = vld [vmem:[%s4369_s18 + $0x160] ss:$8 sps:$4 sm:$0xff]  }
  0x87   : > { %825 = vmatpush1.bf16.msra.mxu1 %v3692_v41  ;;  %v3708_v52 = vld [vmem:[%s4369_s18 + $0x174] ss:$8 sps:$4 sm:$0xff]   ;;  %v3710_v53 = vld [vmem:[%s4369_s18 + $0x170] ss:$8 sps:$4 sm:$0xff]   ;;  %v3711_v54 = vld [vmem:[%s4369_s18 + $0x184] ss:$8 sps:$4 sm:$0xff]  }
  0x88   : > { %826 = vmatprep.subr.bf16.mxu1 %v3693_v42  ;;  %v3713_v55 = vld [vmem:[%s4369_s18 + $0x180] ss:$8 sps:$4 sm:$0xff]   ;;  %v3714_v56 = vld [vmem:[%s4369_s18 + $0x194] ss:$8 sps:$4 sm:$0xff]   ;;  %v3716_v57 = vld [vmem:[%s4369_s18 + $0x190] ss:$8 sps:$4 sm:$0xff]  }
  0x89   : > { %446 = vmatpush1.bf16.msra.mxu0 %v3653_v11  ;;  %v3717_v58 = vld [vmem:[%s4369_s18 + $0x1a4] ss:$8 sps:$4 sm:$0xff]   ;;  %v3719_v59 = vld [vmem:[%s4369_s18 + $0x1a0] ss:$8 sps:$4 sm:$0xff]   ;;  %v3720_v60 = vld [vmem:[%s4369_s18 + $0x1b4] ss:$8 sps:$4 sm:$0xff]  }
  0x8a   : > { %447 = vmatprep.subr.bf16.mxu0 %v3654_v12  ;;  %v3722_v61 = vld [vmem:[%s4369_s18 + $0x1b0] ss:$8 sps:$4 sm:$0xff]   ;;  %v3723_v62 = vld [vmem:[%s4369_s18 + $0x1c4] ss:$8 sps:$4 sm:$0xff]   ;;  %v3725_v63 = vld [vmem:[%s4369_s18 + $0x1c0] ss:$8 sps:$4 sm:$0xff]  }
  0x8b   : > { %827 = vmatpush1.bf16.msra.mxu1 %v3695_v43  ;;  %v3726_v0 = vld [vmem:[%s4369_s18 + $0x1d4] ss:$8 sps:$4 sm:$0xff]   ;;  %v3728_v1 = vld [vmem:[%s4369_s18 + $0x1d0] ss:$8 sps:$4 sm:$0xff]   ;;  %v3729_v2 = vld [vmem:[%s4369_s18 + $0x1e4] ss:$8 sps:$4 sm:$0xff]  }
  0x8c   : > { %828 = vmatprep.subr.bf16.mxu1 %v3696_v44  ;;  %v3731_v3 = vld [vmem:[%s4369_s18 + $0x1e0] ss:$8 sps:$4 sm:$0xff]   ;;  %v3732_v4 = vld [vmem:[%s4369_s18 + $0x1f4] ss:$8 sps:$4 sm:$0xff]   ;;  %v3734_v5 = vld [vmem:[%s4369_s18 + $0x1f0] ss:$8 sps:$4 sm:$0xff]  }
  0x8d   : > { %448 = vmatpush1.bf16.msra.mxu0 %v3656_v13  ;;  %s4474_s30 = smul.u32 7, %s4233_s19  ;;  %p3594_p5 = scmp.eq.s32.totalorder %s4233_s19, 1 }
  0x8e   : > { %449 = vmatprep.subr.bf16.mxu0 %v3657_v14 }
  0x8f   : > { %829 = vmatpush1.bf16.msra.mxu1 %v3698_v45  ;;  %p592_p7 = scmp.lt.s32.totalorder %s4474_s30, 13  ;;  %s626_s24 = sadd.s32 1, %s4474_s30 }
  0x90   : > { %830 = vmatprep.subr.bf16.mxu1 %v3699_v46  ;;  %p976_p11 = scmp.lt.s32.totalorder %s626_s24, 13  ;;  %s4591_s28 = scalar_lea.smem [#allocation10], %s4474_s30 }
  0x91   : > { %450 = vmatpush1.bf16.msra.mxu0 %v3659_v15  ;;  %s593_s6 = scalar_select %p592_p7, 1, 0 }
  0x92   : > { %451 = vmatprep.subr.bf16.mxu0 %v3660_v17  ;;  %s977_s10 = scalar_select %p976_p11, 1, 0 }
  0x93   : > { %831 = vmatpush1.bf16.msra.mxu1 %v3701_v47  ;;  %s1010_s13 = sadd.s32 2, %s4474_s30  ;;  %s2999_s15 = scalar_lea.smem %s4591_s28, 1 [#allocation10] }
  0x94   : > { %832 = vmatprep.subr.bf16.mxu1 %v3702_v48  ;;  %v4186_v48 = vmov 1983009808   ;;  %p1360_p13 = scmp.lt.s32.totalorder %s1010_s13, 13  ;;  %s1394_s29 = sadd.s32 3, %s4474_s30 }
  0x95   : > { %452 = vmatpush1.bf16.msra.mxu0 %v3662_v20  ;;  %p1744_p12 = scmp.lt.s32.totalorder %s1394_s29, 13  ;;  %s3006_s25 = scalar_lea.smem %s4591_s28, 2 [#allocation10] }
  0x96   : > { %453 = vmatprep.subr.bf16.mxu0 %v3663_v21  ;;  %s1361_s14 = scalar_select %p1360_p13, 1, 0 }
  0x97   : > { %833 = vmatpush1.bf16.msra.mxu1 %v3704_v49  ;;  %v525_v49 = vunpack.c.l.s4 %v4186_v48  ;;  %v3770_v48 = vld [vmem:[%s4369_s18 + $0x2b4] ss:$8 sps:$4 sm:$0xff]   ;;  %s1745_s9 = scalar_select %p1744_p12, 1, 0 }
  0x98   : > { %834 = vmatprep.subr.bf16.mxu1 %v3705_v50  ;;  %v527_v50 = vlaneseq  ;;  %s1778_s24 = sadd.s32 4, %s4474_s30  ;;  %s2546_s29 = sadd.s32 6, %s4474_s30 }
  0x99   : > { %454 = vmatpush1.bf16.msra.mxu0 %v3665_v22  ;;  %p2128_p8 = scmp.lt.s32.totalorder %s1778_s24, 13  ;;  %p2896_p0 = scmp.lt.s32.totalorder %s2546_s29, 13 }
  0x9a   : > { %455 = vmatprep.subr.bf16.mxu0 %v3666_v23 }
  0x9b   : > { %835 = vmatpush1.bf16.msra.mxu1 %v3707_v51  ;;  %v526_v51 = vunpack.c.0.s8 %v525_v49  ;;  %v3768_v49 = vld [vmem:[%s4369_s18 + $0x2b0] ss:$8 sps:$4 sm:$0xff]  }
  0x9c   : > { %836 = vmatprep.subr.bf16.mxu1 %v3708_v52  ;;  %v528_v52 = vshrl.u32 %v527_v50, 7  ;;  %v3773_v50 = vld [vmem:[%s4369_s18 + $0x2c4] ss:$8 sps:$4 sm:$0xff]  }
  0x9d   : > { %456 = vmatpush1.bf16.msra.mxu0 %v3668_v24 }
  0x9e   : > { %457 = vmatprep.subr.bf16.mxu0 %v3669_v25 }
  0x9f   : > { %837 = vmatpush1.bf16.msra.mxu1 %v3710_v53 }
  0xa0   : > { %838 = vmatprep.subr.bf16.mxu1 %v3711_v54  ;;  %v4460_v54 = vsub.s32 %v526_v51, %v528_v52  ;;  %v3771_v51 = vld [vmem:[%s4369_s18 + $0x2c0] ss:$8 sps:$4 sm:$0xff]  }
  0xa1   : > { %458 = vmatpush1.bf16.msra.mxu0 %v3671_v26 }
  0xa2   : > { %459 = vmatprep.subr.bf16.mxu0 %v3672_v27 }
  0xa3   : > { %839 = vmatpush1.bf16.msra.mxu1 %v3713_v55 }
  0xa4   : > { %840 = vmatprep.subr.bf16.mxu1 %v3714_v56 }
  0xa5   : > { %460 = vmatpush1.bf16.msra.mxu0 %v3674_v28 }
  0xa6   : > { %461 = vmatprep.subr.bf16.mxu0 %v3675_v29 }
  0xa7   : > { %841 = vmatpush1.bf16.msra.mxu1 %v3716_v57  ;;  %v481_v57 = vld [vmem:[%s4462_s26] sm:$0xf] }
  0xa8   : > { %842 = vmatprep.subr.bf16.mxu1 %v3717_v58 }
  0xa9   : > { %462 = vmatpush1.bf16.msra.mxu0 %v3677_v30 }
  0xaa   : > { %463 = vmatprep.subr.bf16.mxu0 %v3678_v31 }
  0xab   : > { %843 = vmatpush1.bf16.msra.mxu1 %v3719_v59  ;;  %v4466_v59 = vsub.s32 0, %v528_v52 }
  0xac   : > { %844 = vmatprep.subr.bf16.mxu1 %v3720_v60  ;;  %v4468_v60 = vsub.s32 2, %v528_v52 }
  0xad   : > { %464 = vmatpush1.bf16.msra.mxu0 %v3680_v32 }
  0xae   : > { %465 = vmatprep.subr.bf16.mxu0 %v3681_v33 }
  0xaf   : > { %845 = vmatpush1.bf16.msra.mxu1 %v3722_v61 }
  0xb0   : > { %846 = vmatprep.subr.bf16.mxu1 %v3723_v62 }
  0xb1   : > { %466 = vmatpush1.bf16.msra.mxu0 %v3683_v34 }
  0xb2   : > { %467 = vmatprep.subr.bf16.mxu0 %v3684_v35 }
  0xb3   : > { %847 = vmatpush1.bf16.msra.mxu1 %v3725_v63 }
  0xb4   : > { %848 = vmatprep.subr.bf16.mxu1 %v3726_v0 }
  0xb5   : > { %468 = vmatpush1.bf16.msra.mxu0 %v3686_v36 }
  0xb7   : > { %849 = vmatpush1.bf16.msra.mxu1 %v3728_v1 }
  0xb8   : > { %470 = vmatmul.mubr.bf16.vlgmr.msra.gmra.mrb[0].mxu0 %v275_v38  ;;  %850 = vmatprep.subr.bf16.mxu1 %v3729_v2 }
  0xbb   : > { %851 = vmatpush1.bf16.msra.mxu1 %v3731_v3 }
  0xbc   : > { %852 = vmatprep.subr.bf16.mxu1 %v3732_v4 }
  0xbf   : > { %853 = vmatpush1.bf16.msra.mxu1 %v3734_v5 }
 0x18b   : > { %v4453_v6 = vpop.f32.mrb[0].mxu0 }
 0x18c   : > { %v482_v7 = vrot.slane %v4453_v6, 4  ;;  %v497_v8 = vmul.f32 %v4453_v6, %v4453_v6  ;;  %v473_v9 = vpop.f32.mrb[1].mxu0 }
 0x18d   : > { %v488_v10 = vrot.slane %v473_v9, 4  ;;  %v498_v11 = vmul.f32 %v473_v9, %v473_v9  ;;  %v475_v12 = vpop.f32.mrb[2].mxu0 }
 0x18e   : > { %v483_v13 = vadd.f32 %v482_v7, %v4453_v6  ;;  %v499_v14 = vrot.slane %v497_v8, 4  ;;  %v476_v15 = vpop.f32.mrb[3].mxu0  ;;  %v4482_v12 = vsub.s32 3, %v528_v52 }
 0x18f   : > { %v489_v17 = vadd.f32 %v488_v10, %v473_v9  ;;  %v505_v18 = vrot.slane %v498_v11, 4 }
 0x190   : > { %v484_v19 = vrot.slane %v483_v13, 2  ;;  %v500_v20 = vadd.f32 %v499_v14, %v497_v8 }
 0x191   : > { %v490_v21 = vrot.slane %v489_v17, 2  ;;  %v506_v22 = vadd.f32 %v505_v18, %v498_v11  ;;  %v4480_v11 = vsub.s32 1, %v528_v52  ;;  %v3776_v52 = vld [vmem:[%s4369_s18 + $0x2d4] ss:$8 sps:$4 sm:$0xff]  }
 0x192   : > { %v485_v23 = vadd.f32 %v484_v19, %v483_v13  ;;  %v501_v24 = vrot.slane %v500_v20, 2 }
 0x193   : > { %v491_v25 = vadd.f32 %v490_v21, %v489_v17  ;;  %v507_v26 = vrot.slane %v506_v22, 2 }
 0x194   : > { %v486_v27 = vrot.slane %v485_v23, 1  ;;  %v502_v28 = vadd.f32 %v501_v24, %v500_v20 }
 0x195   : > { %v492_v29 = vrot.slane %v491_v25, 1  ;;  %v508_v30 = vadd.f32 %v507_v26, %v506_v22 }
 0x196   : > { %v487_v31 = vadd.f32 %v486_v27, %v485_v23  ;;  %v503_v32 = vrot.slane %v502_v28, 1  ;;  %v3737_v27 = vld [vmem:[%s4369_s18 + $0x204] ss:$8 sps:$4 sm:$0xff]  }
 0x197   : > { %v493_v33 = vadd.f32 %v492_v29, %v491_v25  ;;  %v509_v34 = vrot.slane %v508_v30, 1  ;;  %1206 = vmatprep.subr.bf16.mxu0 %v3737_v27  ;;  %v3743_v29 = vld [vmem:[%s4369_s18 + $0x224] ss:$8 sps:$4 sm:$0xff]  }
 0x198   : > { %v495_v35 = vmul.f32 0.125, %v487_v31  ;;  %v504_v36 = vadd.f32 %v503_v32, %v502_v28  ;;  %v3738_v28 = vld [vmem:[%s4369_s18 + $0x210] ss:$8 sps:$4 sm:$0xff]   ;;  %v3746_v31 = vld [vmem:[%s4369_s18 + $0x234] ss:$8 sps:$4 sm:$0xff]  }
 0x199   : > { %v496_v38 = vmul.f32 0.125, %v493_v33  ;;  %v510_v39 = vadd.f32 %v509_v34, %v508_v30  ;;  %v3741_v30 = vld [vmem:[%s4369_s18 + $0x220] ss:$8 sps:$4 sm:$0xff]   ;;  %v3744_v32 = vld [vmem:[%s4369_s18 + $0x230] ss:$8 sps:$4 sm:$0xff]  }
 0x19a   : > { %v511_v40 = vmul.f32 0.125, %v504_v36  ;;  %v513_v41 = vmul.f32 %v495_v35, %v495_v35  ;;  %v3749_v33 = vld [vmem:[%s4369_s18 + $0x244] ss:$8 sps:$4 sm:$0xff]   ;;  %v3747_v34 = vld [vmem:[%s4369_s18 + $0x240] ss:$8 sps:$4 sm:$0xff]  }
 0x19b   : > { %v512_v42 = vmul.f32 0.125, %v510_v39  ;;  %v514_v43 = vmul.f32 %v496_v38, %v496_v38  ;;  %v3750_v36 = vld [vmem:[%s4369_s18 + $0x250] ss:$8 sps:$4 sm:$0xff]   ;;  %v3753_v39 = vld [vmem:[%s4369_s18 + $0x260] ss:$8 sps:$4 sm:$0xff]  }
 0x19c   : > { %v515_v44 = vsub.f32 %v511_v40, %v513_v41  ;;  %v3758_v40 = vld [vmem:[%s4369_s18 + $0x274] ss:$8 sps:$4 sm:$0xff]   ;;  %v3756_v41 = vld [vmem:[%s4369_s18 + $0x270] ss:$8 sps:$4 sm:$0xff]  }
 0x19d   : > { %v516_v45 = vsub.f32 %v512_v42, %v514_v43  ;;  %v3761_v42 = vld [vmem:[%s4369_s18 + $0x284] ss:$8 sps:$4 sm:$0xff]   ;;  %v3759_v43 = vld [vmem:[%s4369_s18 + $0x280] ss:$8 sps:$4 sm:$0xff]  }
 0x19e   : > { %v517_v46 = vadd.f32 1e-05, %v515_v44  ;;  %v3764_v44 = vld [vmem:[%s4369_s18 + $0x294] ss:$8 sps:$4 sm:$0xff]  }
 0x19f   : > { %v518_v47 = vadd.f32 1e-05, %v516_v45  ;;  %v3762_v45 = vld [vmem:[%s4369_s18 + $0x290] ss:$8 sps:$4 sm:$0xff]  }
 0x1a0   : > { %3975 = vrsqrt.f32 %v517_v46  ;;  %v3767_v46 = vld [vmem:[%s4369_s18 + $0x2a4] ss:$8 sps:$4 sm:$0xff]  }
 0x1a1   : > { %3977 = vrsqrt.f32 %v518_v47  ;;  %v3765_v47 = vld [vmem:[%s4369_s18 + $0x2a0] ss:$8 sps:$4 sm:$0xff]  }
 0x1aa   : > { %v3976_v53 = vpop.eup %3975 }
 0x1ab   : > { %v3978_v55 = vpop.eup %3977 }
 0x1ac   : > { %v523_v56 = vcombine.low %v3976_v53, %v3978_v55  ;;  %v3774_v53 = vld [vmem:[%s4369_s18 + $0x2d0] ss:$8 sps:$4 sm:$0xff]   ;;  %v3779_v55 = vld [vmem:[%s4369_s18 + $0x2e4] ss:$8 sps:$4 sm:$0xff]  }
 0x1ae   : > { %v530_v58 = vrot.slane %v523_v56, %v4460_v54  ;;  %v3777_v56 = vld [vmem:[%s4369_s18 + $0x2e0] ss:$8 sps:$4 sm:$0xff]  }
 0x1b0   : > { %v532_v61 = vmul.f32 %v530_v58, %v481_v57  ;;  %v3780_v58 = vld [vmem:[%s4369_s18 + $0x2f0] ss:$8 sps:$4 sm:$0xff]  }
 0x1b2   : > { %v537_v62 = vrot.slane %v532_v61, %v4466_v59  ;;  %v541_v63 = vrot.slane %v532_v61, %v4468_v60  ;;  %v3782_v61 = vld [vmem:[%s4369_s18 + $0x2f4] ss:$8 sps:$4 sm:$0xff]  }
 0x1b4   : > { %v551_v0 = vrot.slane %v541_v63, %v4466_v59  ;;  %v554_v1 = vmul.f32 %v537_v62, %v495_v35  ;;  %v555_v2 = vmul.f32 %v541_v63, %v496_v38  ;;  %v547_v3 = vrot.slane %v537_v62, %v4466_v59  ;;  %v3752_v35 = vld [vmem:[%s4369_s18 + $0x254] ss:$8 sps:$4 sm:$0xff]   ;;  %v3755_v38 = vld [vmem:[%s4369_s18 + $0x264] ss:$8 sps:$4 sm:$0xff]  }
 0x1b6   : > { %v553_v4 = vmul.f32 %v551_v0, %v473_v9  ;;  %v558_v5 = vcombine.low %v554_v1, %v555_v2  ;;  %v552_v7 = vmul.f32 %v547_v3, %v4453_v6  ;;  %v594_v9 = vstv %s593_s6 }
 0x1b7   : > { %vm595_vm0 = vcmp.eq.s32.totalorder %v594_v9, 1 }
 0x1b8   : > { %v565_v8 = vrot.slane %v558_v5, %v4460_v54 }
 0x1ba   : > { %v566_v10 = vrot.slane %v565_v8, 7 }
 0x1bc   : > { %v568_v13 = vsub.f32 %v481_v57, %v566_v10 }
 0x1be   : > { %v577_v14 = vrot.slane %v568_v13, %v4482_v12  ;;  %v573_v15 = vrot.slane %v568_v13, %v4480_v11 }
 0x1c0   : > { %v587_v17 = vrot.slane %v577_v14, %v4480_v11  ;;  %v583_v6 = vrot.slane %v573_v15, %v4480_v11 }
 0x1c2   : > { %v589_v18 = vadd.f32 %v587_v17, %v553_v4  ;;  %v588_v19 = vadd.f32 %v583_v6, %v552_v7 }
 0x1c4   : > { %v591_v20 = vmax.f32 %v589_v18, 0.0  ;;  %v590_v21 = vmax.f32 %v588_v19, 0.0 }
 0x1c6   : > { %v4489_v22 = vsel %vm595_vm0, %v591_v20, %v4395_v16  ;;  %v4492_v23 = vsel %vm595_vm0, %v590_v21, %v4418_v37  ;;  %v3735_v16 = vld [vmem:[%s4369_s18 + $0x200] ss:$8 sps:$4 sm:$0xff]   ;;  %v3740_v37 = vld [vmem:[%s4369_s18 + $0x214] ss:$8 sps:$4 sm:$0xff]  }
 0x1c7   : > { %v661_v24 = vpack.c.bf16 %v4489_v22, %v4489_v22  ;;  %v598_v25 = vadd.f32 %v4489_v22, %v4492_v23  ;;  %v660_v26 = vpack.c.bf16 %v4492_v23, %v4492_v23  ;;  %1207 = vmatpush1.bf16.msra.mxu0 %v3735_v16 }
 0x1c8   : > { %1208 = vmatprep.subr.bf16.mxu0 %v3740_v37 }
 0x1c9   : > { %854 = vmatprep.mubr.bf16.mxu1 %v661_v24  ;;  %599 = vadd.xlane.f32.xlu0 %v598_v25 }
 0x1ca   : > { %855 = vmatmul.mubr.bf16.vlgmr.msra.gmra.mrb[0].mxu1 %v660_v26 }
 0x1cb   : > { %1209 = vmatpush1.bf16.msra.mxu0 %v3738_v28 }
 0x1cc   : > { %1210 = vmatprep.subr.bf16.mxu0 %v3743_v29 }
 0x1cf   : > { %1211 = vmatpush1.bf16.msra.mxu0 %v3741_v30 }
 0x1d0   : > { %1212 = vmatprep.subr.bf16.mxu0 %v3746_v31 }
 0x1d3   : > { %1213 = vmatpush1.bf16.msra.mxu0 %v3744_v32 }
 0x1d4   : > { %1214 = vmatprep.subr.bf16.mxu0 %v3749_v33 }
 0x1d7   : > { %1215 = vmatpush1.bf16.msra.mxu0 %v3747_v34 }
 0x1d8   : > { %1216 = vmatprep.subr.bf16.mxu0 %v3752_v35 }
 0x1db   : > { %1217 = vmatpush1.bf16.msra.mxu0 %v3750_v36 }
 0x1dc   : > { %1218 = vmatprep.subr.bf16.mxu0 %v3755_v38 }
 0x1df   : > { %1219 = vmatpush1.bf16.msra.mxu0 %v3753_v39 }
 0x1e0   : > { %1220 = vmatprep.subr.bf16.mxu0 %v3758_v40 }
 0x1e3   : > { %1221 = vmatpush1.bf16.msra.mxu0 %v3756_v41 }
 0x1e4   : > { %1222 = vmatprep.subr.bf16.mxu0 %v3761_v42 }
 0x1e7   : > { %1223 = vmatpush1.bf16.msra.mxu0 %v3759_v43 }
 0x1e8   : > { %1224 = vmatprep.subr.bf16.mxu0 %v3764_v44 }
 0x1eb   : > { %1225 = vmatpush1.bf16.msra.mxu0 %v3762_v45 }
 0x1ec   : > { %1226 = vmatprep.subr.bf16.mxu0 %v3767_v46 }
 0x1ef   : > { %1227 = vmatpush1.bf16.msra.mxu0 %v3765_v47 }
 0x1f0   : > { %1228 = vmatprep.subr.bf16.mxu0 %v3770_v48 }
 0x1f3   : > { %1229 = vmatpush1.bf16.msra.mxu0 %v3768_v49 }
 0x1f4   : > { %1230 = vmatprep.subr.bf16.mxu0 %v3773_v50 }
 0x1f7   : > { %1231 = vmatpush1.bf16.msra.mxu0 %v3771_v51 }
 0x1f8   : > { %1232 = vmatprep.subr.bf16.mxu0 %v3776_v52 }
 0x1fb   : > { %1233 = vmatpush1.bf16.msra.mxu0 %v3774_v53 }
 0x1fc   : > { %1234 = vmatprep.subr.bf16.mxu0 %v3779_v55 }
 0x1ff   : > { %1235 = vmatpush1.bf16.msra.mxu0 %v3777_v56 }
 0x200   : > { %1236 = vmatprep.subr.bf16.mxu0 %v3782_v61 }
 0x203   : > { %1237 = vmatpush1.bf16.msra.mxu0 %v3780_v58  ;;  %v3189_v58 = vld [vmem:[%s4462_s26 + $0x4] sm:$0xf] }
 0x256   : > { %v600_v57 = vpop.xlane.xlu0 %599 }
 0x257   : > { %v601_v62 = vrot.slane %v600_v57, 4 }
 0x259   : > { %v602_v63 = vadd.f32 %v601_v62, %v600_v57 }
 0x25b   : > { %v603_v0 = vrot.slane %v602_v63, 2 }
 0x25d   : > { %v604_v1 = vadd.f32 %v603_v0, %v602_v63 }
 0x25f   : > { %v605_v2 = vrot.slane %v604_v1, 1 }
 0x261   : > { %v606_v3 = vadd.f32 %v605_v2, %v604_v1 }
 0x263   : > { %3532 = vpush %v606_v3 }
 0x294   : > { %s3533_s7 = spop %3532 }
 0x295   : > { %s608_s8 = smul.f32 0.00048828125, %s3533_s7 }
 0x297   : > { %v609_v4 = vstv %s608_s8 }
 0x298   : > { %v610_v5 = vsub.f32 %v4492_v23, %v609_v4  ;;  %v611_v7 = vsub.f32 %v4489_v22, %v609_v4 }
 0x29a   : > { %v612_v8 = vmul.f32 %v610_v5, %v610_v5  ;;  %v613_v10 = vmul.f32 %v611_v7, %v611_v7 }
 0x29c   : > { %v614_v13 = vadd.f32 %v613_v10, %v612_v8 }
 0x29d   : > { %v856_v14 = vpop.f32.mrb[0].mxu1 }
 0x29e   : > { %v867_v15 = vrot.slane %v856_v14, 4  ;;  %v881_v17 = vmul.f32 %v856_v14, %v856_v14  ;;  %v858_v9 = vpop.f32.mrb[1].mxu1  ;;  %615 = vadd.xlane.f32.xlu0 %v614_v13 }
 0x29f   : > { %v873_v6 = vrot.slane %v858_v9, 4  ;;  %v882_v18 = vmul.f32 %v858_v9, %v858_v9  ;;  %v860_v19 = vpop.f32.mrb[2].mxu1 }
 0x2a0   : > { %v868_v20 = vadd.f32 %v867_v15, %v856_v14  ;;  %v883_v21 = vrot.slane %v881_v17, 4  ;;  %v861_v24 = vpop.f32.mrb[3].mxu1  ;;  %v978_v19 = vstv %s977_s10  ;;  %s2129_s10 = scalar_select %p2128_p8, 1, 0 }
 0x2a1   : > { %v874_v25 = vadd.f32 %v873_v6, %v858_v9  ;;  %v889_v26 = vrot.slane %v882_v18, 4  ;;  %vm979_vm1 = vcmp.eq.s32.totalorder %v978_v19, 1 }
 0x2a2   : > { %v869_v16 = vrot.slane %v868_v20, 2  ;;  %v884_v27 = vadd.f32 %v883_v21, %v881_v17 }
 0x2a3   : > { %v875_v37 = vrot.slane %v874_v25, 2  ;;  %v890_v28 = vadd.f32 %v889_v26, %v882_v18 }
 0x2a4   : > { %v870_v29 = vadd.f32 %v869_v16, %v868_v20  ;;  %v885_v30 = vrot.slane %v884_v27, 2 }
 0x2a5   : > { %v876_v31 = vadd.f32 %v875_v37, %v874_v25  ;;  %v891_v32 = vrot.slane %v890_v28, 2 }
 0x2a6   : > { %v871_v33 = vrot.slane %v870_v29, 1  ;;  %v886_v34 = vadd.f32 %v885_v30, %v884_v27 }
 0x2a7   : > { %v877_v35 = vrot.slane %v876_v31, 1  ;;  %v892_v36 = vadd.f32 %v891_v32, %v890_v28  ;;  %v3788_v32 = vld [vmem:[%s4369_s18 + $0x314] ss:$8 sps:$4 sm:$0xff]  }
 0x2a8   : > { %v872_v38 = vadd.f32 %v871_v33, %v870_v29  ;;  %v887_v39 = vrot.slane %v886_v34, 1  ;;  %v3783_v29 = vld [vmem:[%s4369_s18 + $0x300] ss:$8 sps:$4 sm:$0xff]   ;;  %v3786_v33 = vld [vmem:[%s4369_s18 + $0x310] ss:$8 sps:$4 sm:$0xff]  }
 0x2a9   : > { %v878_v40 = vadd.f32 %v877_v35, %v876_v31  ;;  %v893_v41 = vrot.slane %v892_v36, 1 }
 0x2aa   : > { %v879_v42 = vmul.f32 0.125, %v872_v38  ;;  %v888_v43 = vadd.f32 %v887_v39, %v886_v34  ;;  %v3789_v38 = vld [vmem:[%s4369_s18 + $0x320] ss:$8 sps:$4 sm:$0xff]  }
 0x2ab   : > { %v880_v44 = vmul.f32 0.125, %v878_v40  ;;  %v894_v45 = vadd.f32 %v893_v41, %v892_v36  ;;  %v3791_v36 = vld [vmem:[%s4369_s18 + $0x324] ss:$8 sps:$4 sm:$0xff]   ;;  %v3794_v40 = vld [vmem:[%s4369_s18 + $0x334] ss:$8 sps:$4 sm:$0xff]  }
 0x2ac   : > { %v895_v46 = vmul.f32 0.125, %v888_v43  ;;  %v897_v47 = vmul.f32 %v879_v42, %v879_v42  ;;  %v3792_v41 = vld [vmem:[%s4369_s18 + $0x330] ss:$8 sps:$4 sm:$0xff]   ;;  %v3795_v43 = vld [vmem:[%s4369_s18 + $0x340] ss:$8 sps:$4 sm:$0xff]  }
 0x2ad   : > { %v896_v48 = vmul.f32 0.125, %v894_v45  ;;  %v898_v49 = vmul.f32 %v880_v44, %v880_v44  ;;  %v3798_v45 = vld [vmem:[%s4369_s18 + $0x350] ss:$8 sps:$4 sm:$0xff]  }
 0x2ae   : > { %v899_v50 = vsub.f32 %v895_v46, %v897_v47  ;;  %v3803_v46 = vld [vmem:[%s4369_s18 + $0x364] ss:$8 sps:$4 sm:$0xff]   ;;  %v3801_v47 = vld [vmem:[%s4369_s18 + $0x360] ss:$8 sps:$4 sm:$0xff]  }
 0x2af   : > { %v900_v51 = vsub.f32 %v896_v48, %v898_v49  ;;  %v3806_v48 = vld [vmem:[%s4369_s18 + $0x374] ss:$8 sps:$4 sm:$0xff]   ;;  %v3804_v49 = vld [vmem:[%s4369_s18 + $0x370] ss:$8 sps:$4 sm:$0xff]  }
 0x2b0   : > { %v901_v52 = vadd.f32 1e-05, %v899_v50  ;;  %v3809_v50 = vld [vmem:[%s4369_s18 + $0x384] ss:$8 sps:$4 sm:$0xff]  }
 0x2b1   : > { %v902_v53 = vadd.f32 1e-05, %v900_v51  ;;  %v3807_v51 = vld [vmem:[%s4369_s18 + $0x380] ss:$8 sps:$4 sm:$0xff]  }
 0x2b2   : > { %3979 = vrsqrt.f32 %v901_v52  ;;  %v3812_v52 = vld [vmem:[%s4369_s18 + $0x394] ss:$8 sps:$4 sm:$0xff]  }
 0x2b3   : > { %3981 = vrsqrt.f32 %v902_v53  ;;  %v3810_v53 = vld [vmem:[%s4369_s18 + $0x390] ss:$8 sps:$4 sm:$0xff]  }
 0x2bc   : > { %v3980_v55 = vpop.eup %3979 }
 0x2bd   : > { %v3982_v56 = vpop.eup %3981 }
 0x2be   : > { %v907_v57 = vcombine.low %v3980_v55, %v3982_v56  ;;  %v3815_v55 = vld [vmem:[%s4369_s18 + $0x3a4] ss:$8 sps:$4 sm:$0xff]   ;;  %v3813_v56 = vld [vmem:[%s4369_s18 + $0x3a0] ss:$8 sps:$4 sm:$0xff]  }
 0x2c0   : > { %v914_v61 = vrot.slane %v907_v57, %v4460_v54  ;;  %v3818_v57 = vld [vmem:[%s4369_s18 + $0x3b4] ss:$8 sps:$4 sm:$0xff]  }
 0x2c2   : > { %v916_v62 = vmul.f32 %v3189_v58, %v914_v61  ;;  %v3821_v61 = vld [vmem:[%s4369_s18 + $0x3c4] ss:$8 sps:$4 sm:$0xff]  }
 0x2c4   : > { %v921_v63 = vrot.slane %v916_v62, %v4466_v59  ;;  %v925_v0 = vrot.slane %v916_v62, %v4468_v60  ;;  %v3819_v62 = vld [vmem:[%s4369_s18 + $0x3c0] ss:$8 sps:$4 sm:$0xff]  }
 0x2c6   : > { %v935_v1 = vrot.slane %v925_v0, %v4466_v59  ;;  %v938_v2 = vmul.f32 %v921_v63, %v879_v42  ;;  %v939_v3 = vmul.f32 %v925_v0, %v880_v44  ;;  %v931_v4 = vrot.slane %v921_v63, %v4466_v59  ;;  %v3797_v42 = vld [vmem:[%s4369_s18 + $0x344] ss:$8 sps:$4 sm:$0xff]   ;;  %v3800_v44 = vld [vmem:[%s4369_s18 + $0x354] ss:$8 sps:$4 sm:$0xff]   ;;  %v3822_v0 = vld [vmem:[%s4369_s18 + $0x3d0] ss:$8 sps:$4 sm:$0xff]  }
 0x2c7   : > { %v3824_v63 = vld [vmem:[%s4369_s18 + $0x3d4] ss:$8 sps:$4 sm:$0xff]  }
 0x2c8   : > { %v937_v5 = vmul.f32 %v935_v1, %v858_v9  ;;  %v942_v7 = vcombine.low %v938_v2, %v939_v3  ;;  %v936_v8 = vmul.f32 %v931_v4, %v856_v14  ;;  %v3827_v1 = vld [vmem:[%s4369_s18 + $0x3e4] ss:$8 sps:$4 sm:$0xff]   ;;  %v3825_v2 = vld [vmem:[%s4369_s18 + $0x3e0] ss:$8 sps:$4 sm:$0xff]   ;;  %v3828_v4 = vld [vmem:[%s4369_s18 + $0x3f0] ss:$8 sps:$4 sm:$0xff]  }
 0x2ca   : > { %v949_v10 = vrot.slane %v942_v7, %v4460_v54 }
 0x2cc   : > { %v950_v13 = vrot.slane %v949_v10, 7 }
 0x2ce   : > { %v952_v15 = vsub.f32 %v3189_v58, %v950_v13  ;;  %v3816_v58 = vld [vmem:[%s4369_s18 + $0x3b0] ss:$8 sps:$4 sm:$0xff]  }
 0x2d0   : > { %v961_v17 = vrot.slane %v952_v15, %v4482_v12  ;;  %v957_v6 = vrot.slane %v952_v15, %v4480_v11 }
 0x2d2   : > { %v971_v18 = vrot.slane %v961_v17, %v4480_v11  ;;  %v967_v20 = vrot.slane %v957_v6, %v4480_v11 }
 0x2d4   : > { %v973_v21 = vadd.f32 %v971_v18, %v937_v5  ;;  %v972_v9 = vadd.f32 %v967_v20, %v936_v8  ;;  %v3830_v5 = vld [vmem:[%s4369_s18 + $0x3f4] ss:$8 sps:$4 sm:$0xff]  }
 0x2d6   : > { %v975_v14 = vmax.f32 %v973_v21, 0.0  ;;  %v974_v24 = vmax.f32 %v972_v9, 0.0 }
 0x2d8   : > { %v4547_v25 = vsel %vm979_vm1, %v975_v14, %v4489_v22  ;;  %v4550_v26 = vsel %vm979_vm1, %v974_v24, %v4492_v23  ;;  %v3785_v23 = vld [vmem:[%s4369_s18 + $0x304] ss:$8 sps:$4 sm:$0xff]  }
 0x2d9   : > { %v1045_v16 = vpack.c.bf16 %v4547_v25, %v4547_v25  ;;  %v982_v27 = vadd.f32 %v4547_v25, %v4550_v26  ;;  %v1044_v37 = vpack.c.bf16 %v4550_v26, %v4550_v26  ;;  %1590 = vmatprep.subr.bf16.mxu1 %v3785_v23 }
 0x2da   : > { %1591 = vmatpush1.bf16.msra.mxu1 %v3783_v29 }
 0x2db   : > { %1238 = vmatprep.mubr.bf16.mxu0 %v1045_v16  ;;  %983 = vadd.xlane.f32.xlu1 %v982_v27 }
 0x2dc   : > { %1239 = vmatmul.mubr.bf16.vlgmr.msra.gmra.mrb[4].mxu0 %v1044_v37  ;;  %1592 = vmatprep.subr.bf16.mxu1 %v3788_v32 }
 0x2de   : > { %1593 = vmatpush1.bf16.msra.mxu1 %v3786_v33 }
 0x2df   : > { %1594 = vmatprep.subr.bf16.mxu1 %v3791_v36 }
 0x2e2   : > { %1595 = vmatpush1.bf16.msra.mxu1 %v3789_v38 }
 0x2e3   : > { %1596 = vmatprep.subr.bf16.mxu1 %v3794_v40 }
 0x2e6   : > { %1597 = vmatpush1.bf16.msra.mxu1 %v3792_v41 }
 0x2e7   : > { %1598 = vmatprep.subr.bf16.mxu1 %v3797_v42 }
 0x2ea   : > { %1599 = vmatpush1.bf16.msra.mxu1 %v3795_v43 }
 0x2eb   : > { %1600 = vmatprep.subr.bf16.mxu1 %v3800_v44 }
 0x2ee   : > { %1601 = vmatpush1.bf16.msra.mxu1 %v3798_v45 }
 0x2ef   : > { %1602 = vmatprep.subr.bf16.mxu1 %v3803_v46 }
 0x2f2   : > { %1603 = vmatpush1.bf16.msra.mxu1 %v3801_v47 }
 0x2f3   : > { %1604 = vmatprep.subr.bf16.mxu1 %v3806_v48 }
 0x2f6   : > { %1605 = vmatpush1.bf16.msra.mxu1 %v3804_v49 }
 0x2f7   : > { %1606 = vmatprep.subr.bf16.mxu1 %v3809_v50 }
 0x2fa   : > { %1607 = vmatpush1.bf16.msra.mxu1 %v3807_v51 }
 0x2fb   : > { %1608 = vmatprep.subr.bf16.mxu1 %v3812_v52 }
 0x2fe   : > { %1609 = vmatpush1.bf16.msra.mxu1 %v3810_v53 }
 0x2ff   : > { %1610 = vmatprep.subr.bf16.mxu1 %v3815_v55 }
 0x302   : > { %1611 = vmatpush1.bf16.msra.mxu1 %v3813_v56 }
 0x303   : > { %1612 = vmatprep.subr.bf16.mxu1 %v3818_v57 }
 0x306   : > { %1613 = vmatpush1.bf16.msra.mxu1 %v3816_v58 }
 0x307   : > { %1614 = vmatprep.subr.bf16.mxu1 %v3821_v61 }
 0x30a   : > { %1615 = vmatpush1.bf16.msra.mxu1 %v3819_v62 }
 0x30b   : > { %1616 = vmatprep.subr.bf16.mxu1 %v3824_v63 }
 0x30e   : > { %1617 = vmatpush1.bf16.msra.mxu1 %v3822_v0 }
 0x30f   : > { %1618 = vmatprep.subr.bf16.mxu1 %v3827_v1 }
 0x312   : > { %1619 = vmatpush1.bf16.msra.mxu1 %v3825_v2 }
 0x313   : > { %1620 = vmatprep.subr.bf16.mxu1 %v3830_v5 }
 0x316   : > { %1621 = vmatpush1.bf16.msra.mxu1 %v3828_v4  ;;  %v3255_v4 = vld [vmem:[%s4462_s26 + $0x8] sm:$0xf] }
 0x32b   : > { %v616_v22 = vpop.xlane.xlu0 %615 }
 0x32c   : > { %v617_v28 = vrot.slane %v616_v22, 4 }
 0x32e   : > { %v618_v30 = vadd.f32 %v617_v28, %v616_v22 }
 0x330   : > { %v619_v31 = vrot.slane %v618_v30, 2 }
 0x332   : > { %v620_v34 = vadd.f32 %v619_v31, %v618_v30 }
 0x334   : > { %v621_v35 = vrot.slane %v620_v34, 1 }
 0x336   : > { %v622_v39 = vadd.f32 %v621_v35, %v620_v34 }
 0x338   : > { %3534 = vpush %v622_v39 }
 0x368   : > { %v984_v3 = vpop.xlane.xlu1 %983 }
 0x369   : > { %v985_v7 = vrot.slane %v984_v3, 4  ;;  %s3535_s11 = spop %3534 }
 0x36a   : > { %625 = sst [smem:[%s4591_s28]] %s3535_s11  ;;  %s3013_s11 = scalar_lea.smem %s4591_s28, 3 [#allocation10] }
 0x36b   : > { %v986_v8 = vadd.f32 %v985_v7, %v984_v3 }
 0x36d   : > { %v987_v10 = vrot.slane %v986_v8, 2 }
 0x36f   : > { %v988_v13 = vadd.f32 %v987_v10, %v986_v8 }
 0x371   : > { %v989_v15 = vrot.slane %v988_v13, 1 }
 0x373   : > { %v990_v17 = vadd.f32 %v989_v15, %v988_v13 }
 0x375   : > { %3536 = vpush %v990_v17 }
 0x3a6   : > { %s3537_s27 = spop %3536 }
 0x3a7   : > { %s992_s12 = smul.f32 0.00048828125, %s3537_s27 }
 0x3a9   : > { %v993_v6 = vstv %s992_s12 }
 0x3aa   : > { %v994_v18 = vsub.f32 %v4550_v26, %v993_v6  ;;  %v995_v19 = vsub.f32 %v4547_v25, %v993_v6 }
 0x3ac   : > { %v996_v20 = vmul.f32 %v994_v18, %v994_v18  ;;  %v997_v21 = vmul.f32 %v995_v19, %v995_v19 }
 0x3ae   : > { %v998_v9 = vadd.f32 %v997_v21, %v996_v20 }
 0x3af   : > { %v1240_v14 = vpop.f32.mrb[4].mxu0 }
 0x3b0   : > { %v1251_v24 = vrot.slane %v1240_v14, 4  ;;  %v1265_v16 = vmul.f32 %v1240_v14, %v1240_v14  ;;  %999 = vadd.xlane.f32.xlu1 %v998_v9  ;;  %v1242_v27 = vpop.f32.mrb[5].mxu0 }
 0x3b1   : > { %v1257_v37 = vrot.slane %v1242_v27, 4  ;;  %v1266_v22 = vmul.f32 %v1242_v27, %v1242_v27  ;;  %v1244_v28 = vpop.f32.mrb[6].mxu0 }
 0x3b2   : > { %v1252_v29 = vadd.f32 %v1251_v24, %v1240_v14  ;;  %v1267_v23 = vrot.slane %v1265_v16, 4  ;;  %v1245_v30 = vpop.f32.mrb[7].mxu0  ;;  %v1362_v28 = vstv %s1361_s14 }
 0x3b3   : > { %v1258_v31 = vadd.f32 %v1257_v37, %v1242_v27  ;;  %v1273_v32 = vrot.slane %v1266_v22, 4  ;;  %vm1363_vm2 = vcmp.eq.s32.totalorder %v1362_v28, 1 }
 0x3b4   : > { %v1253_v33 = vrot.slane %v1252_v29, 2  ;;  %v1268_v34 = vadd.f32 %v1267_v23, %v1265_v16 }
 0x3b5   : > { %v1259_v35 = vrot.slane %v1258_v31, 2  ;;  %v1274_v36 = vadd.f32 %v1273_v32, %v1266_v22 }
 0x3b6   : > { %v1254_v38 = vadd.f32 %v1253_v33, %v1252_v29  ;;  %v1269_v39 = vrot.slane %v1268_v34, 2 }
 0x3b7   : > { %v1260_v40 = vadd.f32 %v1259_v35, %v1258_v31  ;;  %v1275_v41 = vrot.slane %v1274_v36, 2 }
 0x3b8   : > { %v1255_v42 = vrot.slane %v1254_v38, 1  ;;  %v1270_v43 = vadd.f32 %v1269_v39, %v1268_v34 }
 0x3b9   : > { %v1261_v44 = vrot.slane %v1260_v40, 1  ;;  %v1276_v45 = vadd.f32 %v1275_v41, %v1274_v36  ;;  %v3836_v41 = vld [vmem:[%s4369_s18 + $0x414] ss:$8 sps:$4 sm:$0xff]  }
 0x3ba   : > { %v1256_v46 = vadd.f32 %v1255_v42, %v1254_v38  ;;  %v1271_v47 = vrot.slane %v1270_v43, 1  ;;  %v3831_v38 = vld [vmem:[%s4369_s18 + $0x400] ss:$8 sps:$4 sm:$0xff]   ;;  %v3834_v42 = vld [vmem:[%s4369_s18 + $0x410] ss:$8 sps:$4 sm:$0xff]  }
 0x3bb   : > { %v1262_v48 = vadd.f32 %v1261_v44, %v1260_v40  ;;  %v1277_v49 = vrot.slane %v1276_v45, 1 }
 0x3bc   : > { %v1263_v50 = vmul.f32 0.125, %v1256_v46  ;;  %v1272_v51 = vadd.f32 %v1271_v47, %v1270_v43  ;;  %v3837_v46 = vld [vmem:[%s4369_s18 + $0x420] ss:$8 sps:$4 sm:$0xff]  }
 0x3bd   : > { %v1264_v52 = vmul.f32 0.125, %v1262_v48  ;;  %v1278_v53 = vadd.f32 %v1277_v49, %v1276_v45  ;;  %v3839_v45 = vld [vmem:[%s4369_s18 + $0x424] ss:$8 sps:$4 sm:$0xff]   ;;  %v3842_v48 = vld [vmem:[%s4369_s18 + $0x434] ss:$8 sps:$4 sm:$0xff]  }
 0x3be   : > { %v1279_v55 = vmul.f32 0.125, %v1272_v51  ;;  %v1281_v56 = vmul.f32 %v1263_v50, %v1263_v50  ;;  %v3840_v49 = vld [vmem:[%s4369_s18 + $0x430] ss:$8 sps:$4 sm:$0xff]   ;;  %v3843_v51 = vld [vmem:[%s4369_s18 + $0x440] ss:$8 sps:$4 sm:$0xff]  }
 0x3bf   : > { %v1280_v57 = vmul.f32 0.125, %v1278_v53  ;;  %v1282_v58 = vmul.f32 %v1264_v52, %v1264_v52  ;;  %v3846_v53 = vld [vmem:[%s4369_s18 + $0x450] ss:$8 sps:$4 sm:$0xff]  }
 0x3c0   : > { %v1283_v61 = vsub.f32 %v1279_v55, %v1281_v56  ;;  %v3851_v55 = vld [vmem:[%s4369_s18 + $0x464] ss:$8 sps:$4 sm:$0xff]   ;;  %v3849_v56 = vld [vmem:[%s4369_s18 + $0x460] ss:$8 sps:$4 sm:$0xff]  }
 0x3c1   : > { %v1284_v62 = vsub.f32 %v1280_v57, %v1282_v58  ;;  %v3854_v57 = vld [vmem:[%s4369_s18 + $0x474] ss:$8 sps:$4 sm:$0xff]   ;;  %v3852_v58 = vld [vmem:[%s4369_s18 + $0x470] ss:$8 sps:$4 sm:$0xff]  }
 0x3c2   : > { %v1285_v63 = vadd.f32 1e-05, %v1283_v61  ;;  %v3857_v61 = vld [vmem:[%s4369_s18 + $0x484] ss:$8 sps:$4 sm:$0xff]  }
 0x3c3   : > { %v1286_v0 = vadd.f32 1e-05, %v1284_v62  ;;  %v3855_v62 = vld [vmem:[%s4369_s18 + $0x480] ss:$8 sps:$4 sm:$0xff]  }
 0x3c4   : > { %3983 = vrsqrt.f32 %v1285_v63  ;;  %v3860_v63 = vld [vmem:[%s4369_s18 + $0x494] ss:$8 sps:$4 sm:$0xff]  }
 0x3c5   : > { %3985 = vrsqrt.f32 %v1286_v0  ;;  %v3858_v0 = vld [vmem:[%s4369_s18 + $0x490] ss:$8 sps:$4 sm:$0xff]  }
 0x3ce   : > { %v3984_v1 = vpop.eup %3983 }
 0x3cf   : > { %v3986_v2 = vpop.eup %3985 }
 0x3d0   : > { %v1291_v3 = vcombine.low %v3984_v1, %v3986_v2  ;;  %v3863_v1 = vld [vmem:[%s4369_s18 + $0x4a4] ss:$8 sps:$4 sm:$0xff]   ;;  %v3861_v2 = vld [vmem:[%s4369_s18 + $0x4a0] ss:$8 sps:$4 sm:$0xff]  }
 0x3d2   : > { %v1298_v5 = vrot.slane %v1291_v3, %v4460_v54  ;;  %v3866_v3 = vld [vmem:[%s4369_s18 + $0x4b4] ss:$8 sps:$4 sm:$0xff]  }
 0x3d4   : > { %v1300_v7 = vmul.f32 %v3255_v4, %v1298_v5  ;;  %v3869_v5 = vld [vmem:[%s4369_s18 + $0x4c4] ss:$8 sps:$4 sm:$0xff]  }
 0x3d6   : > { %v1305_v8 = vrot.slane %v1300_v7, %v4466_v59  ;;  %v1309_v10 = vrot.slane %v1300_v7, %v4468_v60  ;;  %v3867_v7 = vld [vmem:[%s4369_s18 + $0x4c0] ss:$8 sps:$4 sm:$0xff]  }
 0x3d8   : > { %v1319_v13 = vrot.slane %v1309_v10, %v4466_v59  ;;  %v1322_v15 = vmul.f32 %v1305_v8, %v1263_v50  ;;  %v1323_v17 = vmul.f32 %v1309_v10, %v1264_v52  ;;  %v1315_v6 = vrot.slane %v1305_v8, %v4466_v59  ;;  %v3845_v50 = vld [vmem:[%s4369_s18 + $0x444] ss:$8 sps:$4 sm:$0xff]   ;;  %v3848_v52 = vld [vmem:[%s4369_s18 + $0x454] ss:$8 sps:$4 sm:$0xff]   ;;  %v3870_v10 = vld [vmem:[%s4369_s18 + $0x4d0] ss:$8 sps:$4 sm:$0xff]  }
 0x3d9   : > { %v3872_v8 = vld [vmem:[%s4369_s18 + $0x4d4] ss:$8 sps:$4 sm:$0xff]  }
 0x3da   : > { %v1321_v18 = vmul.f32 %v1319_v13, %v1242_v27  ;;  %v1326_v19 = vcombine.low %v1322_v15, %v1323_v17  ;;  %v1320_v20 = vmul.f32 %v1315_v6, %v1240_v14  ;;  %v3875_v13 = vld [vmem:[%s4369_s18 + $0x4e4] ss:$8 sps:$4 sm:$0xff]   ;;  %v3873_v15 = vld [vmem:[%s4369_s18 + $0x4e0] ss:$8 sps:$4 sm:$0xff]   ;;  %v3876_v6 = vld [vmem:[%s4369_s18 + $0x4f0] ss:$8 sps:$4 sm:$0xff]  }
 0x3dc   : > { %v1333_v21 = vrot.slane %v1326_v19, %v4460_v54 }
 0x3de   : > { %v1334_v9 = vrot.slane %v1333_v21, 7 }
 0x3e0   : > { %v1336_v24 = vsub.f32 %v3255_v4, %v1334_v9  ;;  %v3864_v4 = vld [vmem:[%s4369_s18 + $0x4b0] ss:$8 sps:$4 sm:$0xff]  }
 0x3e2   : > { %v1345_v16 = vrot.slane %v1336_v24, %v4482_v12  ;;  %v1341_v37 = vrot.slane %v1336_v24, %v4480_v11 }
 0x3e4   : > { %v1355_v22 = vrot.slane %v1345_v16, %v4480_v11  ;;  %v1351_v29 = vrot.slane %v1341_v37, %v4480_v11 }
 0x3e6   : > { %v1357_v23 = vadd.f32 %v1355_v22, %v1321_v18  ;;  %v1356_v27 = vadd.f32 %v1351_v29, %v1320_v20  ;;  %v3878_v18 = vld [vmem:[%s4369_s18 + $0x4f4] ss:$8 sps:$4 sm:$0xff]  }
 0x3e8   : > { %v1359_v14 = vmax.f32 %v1357_v23, 0.0  ;;  %v1358_v30 = vmax.f32 %v1356_v27, 0.0 }
 0x3ea   : > { %v4609_v31 = vsel %vm1363_vm2, %v1359_v14, %v4547_v25  ;;  %v4612_v32 = vsel %vm1363_vm2, %v1358_v30, %v4550_v26  ;;  %v3833_v26 = vld [vmem:[%s4369_s18 + $0x404] ss:$8 sps:$4 sm:$0xff]  }
 0x3eb   : > { %v1429_v33 = vpack.c.bf16 %v4609_v31, %v4609_v31  ;;  %v1366_v34 = vadd.f32 %v4609_v31, %v4612_v32  ;;  %v1428_v35 = vpack.c.bf16 %v4612_v32, %v4612_v32  ;;  %1974 = vmatprep.subr.bf16.mxu0 %v3833_v26 }
 0x3ec   : > { %1975 = vmatpush1.bf16.msra.mxu0 %v3831_v38 }
 0x3ed   : > { %1622 = vmatprep.mubr.bf16.mxu1 %v1429_v33  ;;  %1367 = vadd.xlane.f32.xlu0 %v1366_v34 }
 0x3ee   : > { %1623 = vmatmul.mubr.bf16.vlgmr.msra.gmra.mrb[4].mxu1 %v1428_v35  ;;  %1976 = vmatprep.subr.bf16.mxu0 %v3836_v41 }
 0x3f0   : > { %1977 = vmatpush1.bf16.msra.mxu0 %v3834_v42 }
 0x3f1   : > { %1978 = vmatprep.subr.bf16.mxu0 %v3839_v45 }
 0x3f4   : > { %1979 = vmatpush1.bf16.msra.mxu0 %v3837_v46 }
 0x3f5   : > { %1980 = vmatprep.subr.bf16.mxu0 %v3842_v48 }
 0x3f8   : > { %1981 = vmatpush1.bf16.msra.mxu0 %v3840_v49 }
 0x3f9   : > { %1982 = vmatprep.subr.bf16.mxu0 %v3845_v50 }
 0x3fc   : > { %1983 = vmatpush1.bf16.msra.mxu0 %v3843_v51 }
 0x3fd   : > { %1984 = vmatprep.subr.bf16.mxu0 %v3848_v52 }
 0x400   : > { %1985 = vmatpush1.bf16.msra.mxu0 %v3846_v53 }
 0x401   : > { %1986 = vmatprep.subr.bf16.mxu0 %v3851_v55 }
 0x404   : > { %1987 = vmatpush1.bf16.msra.mxu0 %v3849_v56 }
 0x405   : > { %1988 = vmatprep.subr.bf16.mxu0 %v3854_v57 }
 0x408   : > { %1989 = vmatpush1.bf16.msra.mxu0 %v3852_v58 }
 0x409   : > { %1990 = vmatprep.subr.bf16.mxu0 %v3857_v61 }
 0x40c   : > { %1991 = vmatpush1.bf16.msra.mxu0 %v3855_v62 }
 0x40d   : > { %1992 = vmatprep.subr.bf16.mxu0 %v3860_v63 }
 0x410   : > { %1993 = vmatpush1.bf16.msra.mxu0 %v3858_v0 }
 0x411   : > { %1994 = vmatprep.subr.bf16.mxu0 %v3863_v1 }
 0x414   : > { %1995 = vmatpush1.bf16.msra.mxu0 %v3861_v2 }
 0x415   : > { %1996 = vmatprep.subr.bf16.mxu0 %v3866_v3 }
 0x418   : > { %1997 = vmatpush1.bf16.msra.mxu0 %v3864_v4 }
 0x419   : > { %1998 = vmatprep.subr.bf16.mxu0 %v3869_v5 }
 0x41c   : > { %1999 = vmatpush1.bf16.msra.mxu0 %v3867_v7 }
 0x41d   : > { %2000 = vmatprep.subr.bf16.mxu0 %v3872_v8 }
 0x420   : > { %2001 = vmatpush1.bf16.msra.mxu0 %v3870_v10 }
 0x421   : > { %2002 = vmatprep.subr.bf16.mxu0 %v3875_v13 }
 0x424   : > { %2003 = vmatpush1.bf16.msra.mxu0 %v3873_v15 }
 0x425   : > { %2004 = vmatprep.subr.bf16.mxu0 %v3878_v18 }
 0x428   : > { %2005 = vmatpush1.bf16.msra.mxu0 %v3876_v6  ;;  %v3321_v6 = vld [vmem:[%s4462_s26 + $0xc] sm:$0xf] }
 0x43d   : > { %v1000_v25 = vpop.xlane.xlu1 %999 }
 0x43e   : > { %v1001_v36 = vrot.slane %v1000_v25, 4 }
 0x440   : > { %v1002_v39 = vadd.f32 %v1001_v36, %v1000_v25 }
 0x442   : > { %v1003_v40 = vrot.slane %v1002_v39, 2 }
 0x444   : > { %v1004_v43 = vadd.f32 %v1003_v40, %v1002_v39 }
 0x446   : > { %v1005_v44 = vrot.slane %v1004_v43, 1 }
 0x448   : > { %v1006_v47 = vadd.f32 %v1005_v44, %v1004_v43 }
 0x44a   : > { %3538 = vpush %v1006_v47 }
 0x47a   : > { %v1368_v17 = vpop.xlane.xlu0 %1367 }
 0x47b   : > { %v1369_v19 = vrot.slane %v1368_v17, 4  ;;  %s3539_s21 = spop %3538 }
 0x47c   : > { %1009 = sst [smem:[%s2999_s15]] %s3539_s21  ;;  %s3020_s15 = scalar_lea.smem %s4591_s28, 4 [#allocation10] }
 0x47d   : > { %v1370_v20 = vadd.f32 %v1369_v19, %v1368_v17 }
 0x47f   : > { %v1371_v21 = vrot.slane %v1370_v20, 2 }
 0x481   : > { %v1372_v9 = vadd.f32 %v1371_v21, %v1370_v20 }
 0x483   : > { %v1373_v24 = vrot.slane %v1372_v9, 1 }
 0x485   : > { %v1374_v16 = vadd.f32 %v1373_v24, %v1372_v9 }
 0x487   : > { %3540 = vpush %v1374_v16 }
 0x4b8   : > { %s3541_s22 = spop %3540 }
 0x4b9   : > { %s1376_s5 = smul.f32 0.00048828125, %s3541_s22 }
 0x4bb   : > { %v1377_v37 = vstv %s1376_s5 }
 0x4bc   : > { %v1378_v22 = vsub.f32 %v4612_v32, %v1377_v37  ;;  %v1379_v28 = vsub.f32 %v4609_v31, %v1377_v37 }
 0x4be   : > { %v1380_v29 = vmul.f32 %v1378_v22, %v1378_v22  ;;  %v1381_v23 = vmul.f32 %v1379_v28, %v1379_v28 }
 0x4c0   : > { %v1382_v27 = vadd.f32 %v1381_v23, %v1380_v29 }
 0x4c1   : > { %v1624_v14 = vpop.f32.mrb[4].mxu1 }
 0x4c2   : > { %v1635_v30 = vrot.slane %v1624_v14, 4  ;;  %v1649_v33 = vmul.f32 %v1624_v14, %v1624_v14  ;;  %v1626_v34 = vpop.f32.mrb[5].mxu1  ;;  %1383 = vadd.xlane.f32.xlu1 %v1382_v27 }
 0x4c3   : > { %v1641_v35 = vrot.slane %v1626_v34, 4  ;;  %v1650_v25 = vmul.f32 %v1626_v34, %v1626_v34  ;;  %v1628_v36 = vpop.f32.mrb[6].mxu1 }
 0x4c4   : > { %v1636_v38 = vadd.f32 %v1635_v30, %v1624_v14  ;;  %v1651_v26 = vrot.slane %v1649_v33, 4  ;;  %v1629_v39 = vpop.f32.mrb[7].mxu1  ;;  %v1746_v36 = vstv %s1745_s9 }
 0x4c5   : > { %v1642_v40 = vadd.f32 %v1641_v35, %v1626_v34  ;;  %v1657_v41 = vrot.slane %v1650_v25, 4  ;;  %vm1747_vm3 = vcmp.eq.s32.totalorder %v1746_v36, 1 }
 0x4c6   : > { %v1637_v42 = vrot.slane %v1636_v38, 2  ;;  %v1652_v43 = vadd.f32 %v1651_v26, %v1649_v33 }
 0x4c7   : > { %v1643_v44 = vrot.slane %v1642_v40, 2  ;;  %v1658_v45 = vadd.f32 %v1657_v41, %v1650_v25 }
 0x4c8   : > { %v1638_v46 = vadd.f32 %v1637_v42, %v1636_v38  ;;  %v1653_v47 = vrot.slane %v1652_v43, 2 }
 0x4c9   : > { %v1644_v48 = vadd.f32 %v1643_v44, %v1642_v40  ;;  %v1659_v49 = vrot.slane %v1658_v45, 2 }
 0x4ca   : > { %v1639_v50 = vrot.slane %v1638_v46, 1  ;;  %v1654_v51 = vadd.f32 %v1653_v47, %v1652_v43 }
 0x4cb   : > { %v1645_v52 = vrot.slane %v1644_v48, 1  ;;  %v1660_v53 = vadd.f32 %v1659_v49, %v1658_v45  ;;  %v3884_v49 = vld [vmem:[%s4369_s18 + $0x514] ss:$8 sps:$4 sm:$0xff]  }
 0x4cc   : > { %v1640_v55 = vadd.f32 %v1639_v50, %v1638_v46  ;;  %v1655_v56 = vrot.slane %v1654_v51, 1  ;;  %v3879_v46 = vld [vmem:[%s4369_s18 + $0x500] ss:$8 sps:$4 sm:$0xff]   ;;  %v3882_v50 = vld [vmem:[%s4369_s18 + $0x510] ss:$8 sps:$4 sm:$0xff]  }
 0x4cd   : > { %v1646_v57 = vadd.f32 %v1645_v52, %v1644_v48  ;;  %v1661_v58 = vrot.slane %v1660_v53, 1 }
 0x4ce   : > { %v1647_v61 = vmul.f32 0.125, %v1640_v55  ;;  %v1656_v62 = vadd.f32 %v1655_v56, %v1654_v51  ;;  %v3885_v55 = vld [vmem:[%s4369_s18 + $0x520] ss:$8 sps:$4 sm:$0xff]  }
 0x4cf   : > { %v1648_v63 = vmul.f32 0.125, %v1646_v57  ;;  %v1662_v0 = vadd.f32 %v1661_v58, %v1660_v53  ;;  %v3887_v53 = vld [vmem:[%s4369_s18 + $0x524] ss:$8 sps:$4 sm:$0xff]   ;;  %v3890_v57 = vld [vmem:[%s4369_s18 + $0x534] ss:$8 sps:$4 sm:$0xff]  }
 0x4d0   : > { %v1663_v1 = vmul.f32 0.125, %v1656_v62  ;;  %v1665_v2 = vmul.f32 %v1647_v61, %v1647_v61  ;;  %v3888_v58 = vld [vmem:[%s4369_s18 + $0x530] ss:$8 sps:$4 sm:$0xff]   ;;  %v3891_v62 = vld [vmem:[%s4369_s18 + $0x540] ss:$8 sps:$4 sm:$0xff]  }
 0x4d1   : > { %v1664_v3 = vmul.f32 0.125, %v1662_v0  ;;  %v1666_v4 = vmul.f32 %v1648_v63, %v1648_v63  ;;  %v3894_v0 = vld [vmem:[%s4369_s18 + $0x550] ss:$8 sps:$4 sm:$0xff]  }
 0x4d2   : > { %v1667_v5 = vsub.f32 %v1663_v1, %v1665_v2  ;;  %v3899_v1 = vld [vmem:[%s4369_s18 + $0x564] ss:$8 sps:$4 sm:$0xff]   ;;  %v3897_v2 = vld [vmem:[%s4369_s18 + $0x560] ss:$8 sps:$4 sm:$0xff]  }
 0x4d3   : > { %v1668_v7 = vsub.f32 %v1664_v3, %v1666_v4  ;;  %v3902_v3 = vld [vmem:[%s4369_s18 + $0x574] ss:$8 sps:$4 sm:$0xff]   ;;  %v3900_v4 = vld [vmem:[%s4369_s18 + $0x570] ss:$8 sps:$4 sm:$0xff]  }
 0x4d4   : > { %v1669_v8 = vadd.f32 1e-05, %v1667_v5  ;;  %v3905_v5 = vld [vmem:[%s4369_s18 + $0x584] ss:$8 sps:$4 sm:$0xff]  }
 0x4d5   : > { %v1670_v10 = vadd.f32 1e-05, %v1668_v7  ;;  %v3903_v7 = vld [vmem:[%s4369_s18 + $0x580] ss:$8 sps:$4 sm:$0xff]  }
 0x4d6   : > { %3987 = vrsqrt.f32 %v1669_v8  ;;  %v3908_v8 = vld [vmem:[%s4369_s18 + $0x594] ss:$8 sps:$4 sm:$0xff]  }
 0x4d7   : > { %3989 = vrsqrt.f32 %v1670_v10  ;;  %v3906_v10 = vld [vmem:[%s4369_s18 + $0x590] ss:$8 sps:$4 sm:$0xff]  }
 0x4e0   : > { %v3988_v13 = vpop.eup %3987 }
 0x4e1   : > { %v3990_v15 = vpop.eup %3989 }
 0x4e2   : > { %v1675_v17 = vcombine.low %v3988_v13, %v3990_v15  ;;  %v3911_v13 = vld [vmem:[%s4369_s18 + $0x5a4] ss:$8 sps:$4 sm:$0xff]   ;;  %v3909_v15 = vld [vmem:[%s4369_s18 + $0x5a0] ss:$8 sps:$4 sm:$0xff]  }
 0x4e4   : > { %v1682_v18 = vrot.slane %v1675_v17, %v4460_v54  ;;  %v3914_v17 = vld [vmem:[%s4369_s18 + $0x5b4] ss:$8 sps:$4 sm:$0xff]  }
 0x4e6   : > { %v1684_v19 = vmul.f32 %v3321_v6, %v1682_v18  ;;  %v3917_v18 = vld [vmem:[%s4369_s18 + $0x5c4] ss:$8 sps:$4 sm:$0xff]  }
 0x4e8   : > { %v1689_v20 = vrot.slane %v1684_v19, %v4466_v59  ;;  %v1693_v21 = vrot.slane %v1684_v19, %v4468_v60  ;;  %v3915_v19 = vld [vmem:[%s4369_s18 + $0x5c0] ss:$8 sps:$4 sm:$0xff]  }
 0x4ea   : > { %v1703_v9 = vrot.slane %v1693_v21, %v4466_v59  ;;  %v1706_v24 = vmul.f32 %v1689_v20, %v1647_v61  ;;  %v1707_v16 = vmul.f32 %v1693_v21, %v1648_v63  ;;  %v1699_v37 = vrot.slane %v1689_v20, %v4466_v59  ;;  %v3893_v61 = vld [vmem:[%s4369_s18 + $0x544] ss:$8 sps:$4 sm:$0xff]   ;;  %v3896_v63 = vld [vmem:[%s4369_s18 + $0x554] ss:$8 sps:$4 sm:$0xff]   ;;  %v3918_v21 = vld [vmem:[%s4369_s18 + $0x5d0] ss:$8 sps:$4 sm:$0xff]  }
 0x4eb   : > { %v3920_v20 = vld [vmem:[%s4369_s18 + $0x5d4] ss:$8 sps:$4 sm:$0xff]  }
 0x4ec   : > { %v1705_v22 = vmul.f32 %v1703_v9, %v1626_v34  ;;  %v1710_v28 = vcombine.low %v1706_v24, %v1707_v16  ;;  %v1704_v29 = vmul.f32 %v1699_v37, %v1624_v14  ;;  %v3923_v9 = vld [vmem:[%s4369_s18 + $0x5e4] ss:$8 sps:$4 sm:$0xff]   ;;  %v3921_v24 = vld [vmem:[%s4369_s18 + $0x5e0] ss:$8 sps:$4 sm:$0xff]   ;;  %v3924_v37 = vld [vmem:[%s4369_s18 + $0x5f0] ss:$8 sps:$4 sm:$0xff]  }
 0x4ee   : > { %v1717_v23 = vrot.slane %v1710_v28, %v4460_v54 }
 0x4f0   : > { %v1718_v27 = vrot.slane %v1717_v23, 7 }
 0x4f2   : > { %v1720_v30 = vsub.f32 %v3321_v6, %v1718_v27  ;;  %v3912_v6 = vld [vmem:[%s4369_s18 + $0x5b0] ss:$8 sps:$4 sm:$0xff]  }
 0x4f4   : > { %v1729_v33 = vrot.slane %v1720_v30, %v4482_v12  ;;  %v1725_v35 = vrot.slane %v1720_v30, %v4480_v11 }
 0x4f6   : > { %v1739_v25 = vrot.slane %v1729_v33, %v4480_v11  ;;  %v1735_v38 = vrot.slane %v1725_v35, %v4480_v11 }
 0x4f8   : > { %v1741_v26 = vadd.f32 %v1739_v25, %v1705_v22  ;;  %v1740_v34 = vadd.f32 %v1735_v38, %v1704_v29  ;;  %v3926_v22 = vld [vmem:[%s4369_s18 + $0x5f4] ss:$8 sps:$4 sm:$0xff]  }
 0x4fa   : > { %v1743_v14 = vmax.f32 %v1741_v26, 0.0  ;;  %v1742_v39 = vmax.f32 %v1740_v34, 0.0 }
 0x4fc   : > { %v4668_v40 = vsel %vm1747_vm3, %v1743_v14, %v4609_v31  ;;  %v4671_v41 = vsel %vm1747_vm3, %v1742_v39, %v4612_v32  ;;  %v3881_v32 = vld [vmem:[%s4369_s18 + $0x504] ss:$8 sps:$4 sm:$0xff]  }
 0x4fd   : > { %v1813_v42 = vpack.c.bf16 %v4668_v40, %v4668_v40  ;;  %v1750_v43 = vadd.f32 %v4668_v40, %v4671_v41  ;;  %v1812_v44 = vpack.c.bf16 %v4671_v41, %v4671_v41  ;;  %2358 = vmatprep.subr.bf16.mxu1 %v3881_v32 }
 0x4fe   : > { %2359 = vmatpush1.bf16.msra.mxu1 %v3879_v46 }
 0x4ff   : > { %2006 = vmatprep.mubr.bf16.mxu0 %v1813_v42  ;;  %1751 = vadd.xlane.f32.xlu0 %v1750_v43 }
 0x500   : > { %2007 = vmatmul.mubr.bf16.vlgmr.msra.gmra.mrb[8].mxu0 %v1812_v44  ;;  %2360 = vmatprep.subr.bf16.mxu1 %v3884_v49 }
 0x502   : > { %2361 = vmatpush1.bf16.msra.mxu1 %v3882_v50 }
 0x503   : > { %2362 = vmatprep.subr.bf16.mxu1 %v3887_v53 }
 0x506   : > { %2363 = vmatpush1.bf16.msra.mxu1 %v3885_v55 }
 0x507   : > { %2364 = vmatprep.subr.bf16.mxu1 %v3890_v57 }
 0x50a   : > { %2365 = vmatpush1.bf16.msra.mxu1 %v3888_v58 }
 0x50b   : > { %2366 = vmatprep.subr.bf16.mxu1 %v3893_v61 }
 0x50e   : > { %2367 = vmatpush1.bf16.msra.mxu1 %v3891_v62 }
 0x50f   : > { %2368 = vmatprep.subr.bf16.mxu1 %v3896_v63 }
 0x512   : > { %2369 = vmatpush1.bf16.msra.mxu1 %v3894_v0 }
 0x513   : > { %2370 = vmatprep.subr.bf16.mxu1 %v3899_v1 }
 0x516   : > { %2371 = vmatpush1.bf16.msra.mxu1 %v3897_v2 }
 0x517   : > { %2372 = vmatprep.subr.bf16.mxu1 %v3902_v3 }
 0x51a   : > { %2373 = vmatpush1.bf16.msra.mxu1 %v3900_v4 }
 0x51b   : > { %2374 = vmatprep.subr.bf16.mxu1 %v3905_v5 }
 0x51e   : > { %2375 = vmatpush1.bf16.msra.mxu1 %v3903_v7 }
 0x51f   : > { %2376 = vmatprep.subr.bf16.mxu1 %v3908_v8 }
 0x522   : > { %2377 = vmatpush1.bf16.msra.mxu1 %v3906_v10 }
 0x523   : > { %2378 = vmatprep.subr.bf16.mxu1 %v3911_v13 }
 0x526   : > { %2379 = vmatpush1.bf16.msra.mxu1 %v3909_v15 }
 0x527   : > { %2380 = vmatprep.subr.bf16.mxu1 %v3914_v17 }
 0x52a   : > { %2381 = vmatpush1.bf16.msra.mxu1 %v3912_v6 }
 0x52b   : > { %2382 = vmatprep.subr.bf16.mxu1 %v3917_v18 }
 0x52e   : > { %2383 = vmatpush1.bf16.msra.mxu1 %v3915_v19 }
 0x52f   : > { %2384 = vmatprep.subr.bf16.mxu1 %v3920_v20 }
 0x532   : > { %2385 = vmatpush1.bf16.msra.mxu1 %v3918_v21 }
 0x533   : > { %2386 = vmatprep.subr.bf16.mxu1 %v3923_v9 }
 0x536   : > { %2387 = vmatpush1.bf16.msra.mxu1 %v3921_v24 }
 0x537   : > { %2388 = vmatprep.subr.bf16.mxu1 %v3926_v22 }
 0x53a   : > { %2389 = vmatpush1.bf16.msra.mxu1 %v3924_v37  ;;  %v3387_v37 = vld [vmem:[%s4462_s26 + $0x10] sm:$0xf] }
 0x54f   : > { %v1384_v31 = vpop.xlane.xlu1 %1383 }
 0x550   : > { %v1385_v45 = vrot.slane %v1384_v31, 4 }
 0x552   : > { %v1386_v47 = vadd.f32 %v1385_v45, %v1384_v31 }
 0x554   : > { %v1387_v48 = vrot.slane %v1386_v47, 2 }
 0x556   : > { %v1388_v51 = vadd.f32 %v1387_v48, %v1386_v47 }
 0x558   : > { %v1389_v52 = vrot.slane %v1388_v51, 1 }
 0x55a   : > { %v1390_v56 = vadd.f32 %v1389_v52, %v1388_v51 }
 0x55c   : > { %3542 = vpush %v1390_v56 }
 0x58c   : > { %v1752_v16 = vpop.xlane.xlu0 %1751 }
 0x58d   : > { %v1753_v28 = vrot.slane %v1752_v16, 4  ;;  %s3543_s6 = spop %3542 }
 0x58e   : > { %1393 = sst [smem:[%s3006_s25]] %s3543_s6 }
 0x58f   : > { %v1754_v29 = vadd.f32 %v1753_v28, %v1752_v16 }
 0x591   : > { %v1755_v23 = vrot.slane %v1754_v29, 2 }
 0x593   : > { %v1756_v27 = vadd.f32 %v1755_v23, %v1754_v29 }
 0x595   : > { %v1757_v30 = vrot.slane %v1756_v27, 1 }
 0x597   : > { %v1758_v33 = vadd.f32 %v1757_v30, %v1756_v27 }
 0x599   : > { %3544 = vpush %v1758_v33 }
 0x5ca   : > { %s3545_s7 = spop %3544 }
 0x5cb   : > { %s1760_s8 = smul.f32 0.00048828125, %s3545_s7  ;;  %s4187_s7 = smov [#allocation9]  }
 0x5cd   : > { %v1761_v35 = vstv %s1760_s8  ;;  %s2939_s8 = sshll.u32 %s4187_s7, 4  ;;  %s2940_s8 = int_to_ptr.vmem [resolvable:$true] %s2939_s8 }
 0x5ce   : > { %v1762_v25 = vsub.f32 %v4671_v41, %v1761_v35  ;;  %v1763_v36 = vsub.f32 %v4668_v40, %v1761_v35  ;;  %s4089_s24 = scalar_lea.vmem %s2940_s8, 256  ;;  %p4096_p2 = scmp.lt.s32.totalorder %s2940_s8, %s2940_s8 }
 0x5cf   : > { %p4090_p9 = scmp.ne.s32.totalorder %s2940_s8, %s4089_s24  ;;  %p4097_p6 = scmp.lt.s32.totalorder %s4089_s24, %s4089_s24 }
 0x5d0   : > { %v1764_v38 = vmul.f32 %v1762_v25, %v1762_v25  ;;  %v1765_v26 = vmul.f32 %v1763_v36, %v1763_v36 }
 0x5d1   : > { %p4091_p1 = pnand %p4090_p9, %p3594_p5  ;;  %p4098_p4 = por %p4097_p6, %p4096_p2 }
 0x5d2   : > { %v1766_v34 = vadd.f32 %v1765_v26, %v1764_v38 }
 0x5d3   : > { %v2008_v14 = vpop.f32.mrb[8].mxu0  ;;  %p4092_p3 = pneg %p4091_p1 }
 0x5d4   : > { %v2019_v39 = vrot.slane %v2008_v14, 4  ;;  %v2033_v42 = vmul.f32 %v2008_v14, %v2008_v14  ;;  %1767 = vadd.xlane.f32.xlu1 %v1766_v34  ;;  %v2010_v43 = vpop.f32.mrb[9].mxu0 }
 0x5d5   : > { %v2025_v44 = vrot.slane %v2010_v43, 4  ;;  %v2034_v31 = vmul.f32 %v2010_v43, %v2010_v43  ;;  %v2012_v45 = vpop.f32.mrb[10].mxu0  ;;  %p4099_p7 = pnand %p4098_p4, %p4092_p3 }
 0x5d6   : > { %v2020_v46 = vadd.f32 %v2019_v39, %v2008_v14  ;;  %v2035_v32 = vrot.slane %v2033_v42, 4  ;;  %v2013_v47 = vpop.f32.mrb[11].mxu0  ;;  %v2130_v45 = vstv %s2129_s10 }
 0x5d7   : > { %v2026_v48 = vadd.f32 %v2025_v44, %v2010_v43  ;;  %v2041_v49 = vrot.slane %v2034_v31, 4  ;;  %vm2131_vm4 = vcmp.eq.s32.totalorder %v2130_v45, 1 }
 0x5d8   : > { %v2021_v50 = vrot.slane %v2020_v46, 2  ;;  %v2036_v51 = vadd.f32 %v2035_v32, %v2033_v42 }
 0x5d9   : > { %v2027_v52 = vrot.slane %v2026_v48, 2  ;;  %v2042_v53 = vadd.f32 %v2041_v49, %v2034_v31 }
 0x5da   : > { %v2022_v55 = vadd.f32 %v2021_v50, %v2020_v46  ;;  %v2037_v56 = vrot.slane %v2036_v51, 2 }
 0x5db   : > { %v2028_v57 = vadd.f32 %v2027_v52, %v2026_v48  ;;  %v2043_v58 = vrot.slane %v2042_v53, 2 }
 0x5dc   : > { %v2023_v61 = vrot.slane %v2022_v55, 1  ;;  %v2038_v62 = vadd.f32 %v2037_v56, %v2036_v51 }
 0x5dd   : > { %v2029_v63 = vrot.slane %v2028_v57, 1  ;;  %v2044_v0 = vadd.f32 %v2043_v58, %v2042_v53  ;;  %v3932_v58 = vld [vmem:[%s4369_s18 + $0x614] ss:$8 sps:$4 sm:$0xff]  }
 0x5de   : > { %v2024_v1 = vadd.f32 %v2023_v61, %v2022_v55  ;;  %v2039_v2 = vrot.slane %v2038_v62, 1  ;;  %v3927_v55 = vld [vmem:[%s4369_s18 + $0x600] ss:$8 sps:$4 sm:$0xff]   ;;  %v3930_v61 = vld [vmem:[%s4369_s18 + $0x610] ss:$8 sps:$4 sm:$0xff]  }
 0x5df   : > { %v2030_v3 = vadd.f32 %v2029_v63, %v2028_v57  ;;  %v2045_v4 = vrot.slane %v2044_v0, 1 }
 0x5e0   : > { %v2031_v5 = vmul.f32 0.125, %v2024_v1  ;;  %v2040_v7 = vadd.f32 %v2039_v2, %v2038_v62  ;;  %v3933_v1 = vld [vmem:[%s4369_s18 + $0x620] ss:$8 sps:$4 sm:$0xff]  }
 0x5e1   : > { %v2032_v8 = vmul.f32 0.125, %v2030_v3  ;;  %v2046_v10 = vadd.f32 %v2045_v4, %v2044_v0  ;;  %v3935_v0 = vld [vmem:[%s4369_s18 + $0x624] ss:$8 sps:$4 sm:$0xff]   ;;  %v3938_v3 = vld [vmem:[%s4369_s18 + $0x634] ss:$8 sps:$4 sm:$0xff]  }
 0x5e2   : > { %v2047_v13 = vmul.f32 0.125, %v2040_v7  ;;  %v2049_v15 = vmul.f32 %v2031_v5, %v2031_v5  ;;  %v3936_v4 = vld [vmem:[%s4369_s18 + $0x630] ss:$8 sps:$4 sm:$0xff]   ;;  %v3939_v7 = vld [vmem:[%s4369_s18 + $0x640] ss:$8 sps:$4 sm:$0xff]  }
 0x5e3   : > { %v2048_v17 = vmul.f32 0.125, %v2046_v10  ;;  %v2050_v6 = vmul.f32 %v2032_v8, %v2032_v8  ;;  %v3942_v10 = vld [vmem:[%s4369_s18 + $0x650] ss:$8 sps:$4 sm:$0xff]  }
 0x5e4   : > { %v2051_v18 = vsub.f32 %v2047_v13, %v2049_v15  ;;  %v3947_v13 = vld [vmem:[%s4369_s18 + $0x664] ss:$8 sps:$4 sm:$0xff]   ;;  %v3945_v15 = vld [vmem:[%s4369_s18 + $0x660] ss:$8 sps:$4 sm:$0xff]  }
 0x5e5   : > { %v2052_v19 = vsub.f32 %v2048_v17, %v2050_v6  ;;  %v3950_v17 = vld [vmem:[%s4369_s18 + $0x674] ss:$8 sps:$4 sm:$0xff]   ;;  %v3948_v6 = vld [vmem:[%s4369_s18 + $0x670] ss:$8 sps:$4 sm:$0xff]  }
 0x5e6   : > { %v2053_v20 = vadd.f32 1e-05, %v2051_v18  ;;  %v3953_v18 = vld [vmem:[%s4369_s18 + $0x684] ss:$8 sps:$4 sm:$0xff]  }
 0x5e7   : > { %v2054_v21 = vadd.f32 1e-05, %v2052_v19  ;;  %v3951_v19 = vld [vmem:[%s4369_s18 + $0x680] ss:$8 sps:$4 sm:$0xff]  }
 0x5e8   : > { %3991 = vrsqrt.f32 %v2053_v20  ;;  %v3956_v20 = vld [vmem:[%s4369_s18 + $0x694] ss:$8 sps:$4 sm:$0xff]  }
 0x5e9   : > { %3993 = vrsqrt.f32 %v2054_v21  ;;  %v3954_v21 = vld [vmem:[%s4369_s18 + $0x690] ss:$8 sps:$4 sm:$0xff]  }
 0x5f2   : > { %v3992_v9 = vpop.eup %3991 }
 0x5f3   : > { %v3994_v24 = vpop.eup %3993 }
 0x5f4   : > { %v2059_v16 = vcombine.low %v3992_v9, %v3994_v24  ;;  %v3959_v9 = vld [vmem:[%s4369_s18 + $0x6a4] ss:$8 sps:$4 sm:$0xff]   ;;  %v3957_v24 = vld [vmem:[%s4369_s18 + $0x6a0] ss:$8 sps:$4 sm:$0xff]  }
 0x5f6   : > { %v2066_v22 = vrot.slane %v2059_v16, %v4460_v54  ;;  %v3962_v16 = vld [vmem:[%s4369_s18 + $0x6b4] ss:$8 sps:$4 sm:$0xff]  }
 0x5f8   : > { %v2068_v28 = vmul.f32 %v3387_v37, %v2066_v22  ;;  %v3965_v22 = vld [vmem:[%s4369_s18 + $0x6c4] ss:$8 sps:$4 sm:$0xff]  }
 0x5fa   : > { %v2073_v29 = vrot.slane %v2068_v28, %v4466_v59  ;;  %v2077_v23 = vrot.slane %v2068_v28, %v4468_v60  ;;  %v3963_v28 = vld [vmem:[%s4369_s18 + $0x6c0] ss:$8 sps:$4 sm:$0xff]  }
 0x5fc   : > { %v2087_v27 = vrot.slane %v2077_v23, %v4466_v59  ;;  %v2090_v30 = vmul.f32 %v2073_v29, %v2031_v5  ;;  %v2091_v33 = vmul.f32 %v2077_v23, %v2032_v8  ;;  %v2083_v35 = vrot.slane %v2073_v29, %v4466_v59  ;;  %v3941_v5 = vld [vmem:[%s4369_s18 + $0x644] ss:$8 sps:$4 sm:$0xff]   ;;  %v3944_v8 = vld [vmem:[%s4369_s18 + $0x654] ss:$8 sps:$4 sm:$0xff]   ;;  %v3966_v23 = vld [vmem:[%s4369_s18 + $0x6d0] ss:$8 sps:$4 sm:$0xff]  }
 0x5fd   : > { %v3968_v29 = vld [vmem:[%s4369_s18 + $0x6d4] ss:$8 sps:$4 sm:$0xff]  }
 0x5fe   : > { %v2089_v25 = vmul.f32 %v2087_v27, %v2010_v43  ;;  %v2094_v36 = vcombine.low %v2090_v30, %v2091_v33  ;;  %v2088_v38 = vmul.f32 %v2083_v35, %v2008_v14  ;;  %v3971_v27 = vld [vmem:[%s4369_s18 + $0x6e4] ss:$8 sps:$4 sm:$0xff]   ;;  %v3969_v30 = vld [vmem:[%s4369_s18 + $0x6e0] ss:$8 sps:$4 sm:$0xff]   ;;  %v3972_v35 = vld [vmem:[%s4369_s18 + $0x6f0] ss:$8 sps:$4 sm:$0xff]  }
 0x600   : > { %v2101_v26 = vrot.slane %v2094_v36, %v4460_v54 }
 0x602   : > { %v2102_v34 = vrot.slane %v2101_v26, 7 }
 0x604   : > { %v2104_v39 = vsub.f32 %v3387_v37, %v2102_v34  ;;  %v3960_v37 = vld [vmem:[%s4369_s18 + $0x6b0] ss:$8 sps:$4 sm:$0xff]  }
 0x606   : > { %v2113_v42 = vrot.slane %v2104_v39, %v4482_v12  ;;  %v2109_v44 = vrot.slane %v2104_v39, %v4480_v11 }
 0x608   : > { %v2123_v31 = vrot.slane %v2113_v42, %v4480_v11  ;;  %v2119_v46 = vrot.slane %v2109_v44, %v4480_v11 }
 0x60a   : > { %v2125_v32 = vadd.f32 %v2123_v31, %v2089_v25  ;;  %v2124_v43 = vadd.f32 %v2119_v46, %v2088_v38  ;;  %v3974_v25 = vld [vmem:[%s4369_s18 + $0x6f4] ss:$8 sps:$4 sm:$0xff]  }
 0x60c   : > { %v2127_v14 = vmax.f32 %v2125_v32, 0.0  ;;  %v2126_v47 = vmax.f32 %v2124_v43, 0.0 }
 0x60e   : > { %v4727_v48 = vsel %vm2131_vm4, %v2127_v14, %v4668_v40  ;;  %v4730_v49 = vsel %vm2131_vm4, %v2126_v47, %v4671_v41  ;;  %v3929_v41 = vld [vmem:[%s4369_s18 + $0x604] ss:$8 sps:$4 sm:$0xff]   ;;  %s2162_s18 = sadd.s32 5, %s4474_s30  ;;  %s3027_s30 = scalar_lea.smem %s4591_s28, 5 [#allocation10] }
 0x60f   : > { %v2197_v50 = vpack.c.bf16 %v4727_v48, %v4727_v48  ;;  %v2134_v51 = vadd.f32 %v4727_v48, %v4730_v49  ;;  %v2196_v52 = vpack.c.bf16 %v4730_v49, %v4730_v49  ;;  %2742 = vmatprep.subr.bf16.mxu0 %v3929_v41  ;;  %p2512_p10 = scmp.lt.s32.totalorder %s2162_s18, 13 }
 0x610   : > { %2743 = vmatpush1.bf16.msra.mxu0 %v3927_v55 }
 0x611   : > { %2390 = vmatprep.mubr.bf16.mxu1 %v2197_v50  ;;  %2135 = vadd.xlane.f32.xlu0 %v2134_v51  ;;  %s2513_s14 = scalar_select %p2512_p10, 1, 0 }
 0x612   : > { %2391 = vmatmul.mubr.bf16.vlgmr.msra.gmra.mrb[8].mxu1 %v2196_v52  ;;  %2744 = vmatprep.subr.bf16.mxu0 %v3932_v58 }
 0x614   : > { %2745 = vmatpush1.bf16.msra.mxu0 %v3930_v61 }
 0x615   : > { %2746 = vmatprep.subr.bf16.mxu0 %v3935_v0 }
 0x618   : > { %2747 = vmatpush1.bf16.msra.mxu0 %v3933_v1 }
 0x619   : > { %2748 = vmatprep.subr.bf16.mxu0 %v3938_v3 }
 0x61c   : > { %2749 = vmatpush1.bf16.msra.mxu0 %v3936_v4 }
 0x61d   : > { %2750 = vmatprep.subr.bf16.mxu0 %v3941_v5 }
 0x620   : > { %2751 = vmatpush1.bf16.msra.mxu0 %v3939_v7 }
 0x621   : > { %2752 = vmatprep.subr.bf16.mxu0 %v3944_v8 }
 0x624   : > { %2753 = vmatpush1.bf16.msra.mxu0 %v3942_v10 }
 0x625   : > { %2754 = vmatprep.subr.bf16.mxu0 %v3947_v13 }
 0x628   : > { %2755 = vmatpush1.bf16.msra.mxu0 %v3945_v15 }
 0x629   : > { %2756 = vmatprep.subr.bf16.mxu0 %v3950_v17 }
 0x62c   : > { %2757 = vmatpush1.bf16.msra.mxu0 %v3948_v6 }
 0x62d   : > { %2758 = vmatprep.subr.bf16.mxu0 %v3953_v18 }
 0x630   : > { %2759 = vmatpush1.bf16.msra.mxu0 %v3951_v19 }
 0x631   : > { %2760 = vmatprep.subr.bf16.mxu0 %v3956_v20 }
 0x634   : > { %2761 = vmatpush1.bf16.msra.mxu0 %v3954_v21 }
 0x635   : > { %2762 = vmatprep.subr.bf16.mxu0 %v3959_v9 }
 0x638   : > { %2763 = vmatpush1.bf16.msra.mxu0 %v3957_v24 }
 0x639   : > { %2764 = vmatprep.subr.bf16.mxu0 %v3962_v16 }
 0x63c   : > { %2765 = vmatpush1.bf16.msra.mxu0 %v3960_v37 }
 0x63d   : > { %2766 = vmatprep.subr.bf16.mxu0 %v3965_v22 }
 0x640   : > { %2767 = vmatpush1.bf16.msra.mxu0 %v3963_v28 }
 0x641   : > { %2768 = vmatprep.subr.bf16.mxu0 %v3968_v29 }
 0x644   : > { %2769 = vmatpush1.bf16.msra.mxu0 %v3966_v23 }
 0x645   : > { %2770 = vmatprep.subr.bf16.mxu0 %v3971_v27 }
 0x648   : > { %2771 = vmatpush1.bf16.msra.mxu0 %v3969_v30 }
 0x649   : > { %2772 = vmatprep.subr.bf16.mxu0 %v3974_v25 }
 0x64c   : > { %2773 = vmatpush1.bf16.msra.mxu0 %v3972_v35  ;;  %v3453_v35 = vld [vmem:[%s4462_s26 + $0x14] sm:$0xf] }
 0x661   : > { %v1768_v40 = vpop.xlane.xlu1 %1767 }
 0x662   : > { %v1769_v53 = vrot.slane %v1768_v40, 4 }
 0x664   : > { %v1770_v56 = vadd.f32 %v1769_v53, %v1768_v40 }
 0x666   : > { %v1771_v57 = vrot.slane %v1770_v56, 2 }
 0x668   : > { %v1772_v62 = vadd.f32 %v1771_v57, %v1770_v56 }
 0x66a   : > { %v1773_v63 = vrot.slane %v1772_v62, 1 }
 0x66c   : > { %v1774_v2 = vadd.f32 %v1773_v63, %v1772_v62 }
 0x66e   : > { %3546 = vpush %v1774_v2 }
 0x69e   : > { %v2136_v33 = vpop.xlane.xlu0 %2135 }
 0x69f   : > { %v2137_v36 = vrot.slane %v2136_v33, 4  ;;  %s3547_s27 = spop %3546 }
 0x6a0   : > { %1777 = sst [smem:[%s3013_s11]] %s3547_s27 }
 0x6a1   : > { %v2138_v38 = vadd.f32 %v2137_v36, %v2136_v33 }
 0x6a3   : > { %v2139_v26 = vrot.slane %v2138_v38, 2 }
 0x6a5   : > { %v2140_v34 = vadd.f32 %v2139_v26, %v2138_v38 }
 0x6a7   : > { %v2141_v39 = vrot.slane %v2140_v34, 1 }
 0x6a9   : > { %v2142_v42 = vadd.f32 %v2141_v39, %v2140_v34 }
 0x6ab   : > { %3548 = vpush %v2142_v42 }
 0x6dc   : > { %s3549_s12 = spop %3548 }
 0x6dd   : > { %s2144_s13 = smul.f32 0.00048828125, %s3549_s12 }
 0x6df   : > { %v2145_v44 = vstv %s2144_s13 }
 0x6e0   : > { %v2146_v31 = vsub.f32 %v4730_v49, %v2145_v44  ;;  %v2147_v45 = vsub.f32 %v4727_v48, %v2145_v44 }
 0x6e2   : > { %v2148_v46 = vmul.f32 %v2146_v31, %v2146_v31  ;;  %v2149_v32 = vmul.f32 %v2147_v45, %v2147_v45 }
 0x6e4   : > { %v2150_v43 = vadd.f32 %v2149_v32, %v2148_v46 }
 0x6e5   : > { %v2392_v14 = vpop.f32.mrb[8].mxu1 }
 0x6e6   : > { %v2403_v47 = vrot.slane %v2392_v14, 4  ;;  %v2417_v50 = vmul.f32 %v2392_v14, %v2392_v14  ;;  %v2394_v51 = vpop.f32.mrb[9].mxu1  ;;  %2151 = vadd.xlane.f32.xlu1 %v2150_v43 }
 0x6e7   : > { %v2409_v52 = vrot.slane %v2394_v51, 4  ;;  %v2418_v40 = vmul.f32 %v2394_v51, %v2394_v51  ;;  %v2396_v53 = vpop.f32.mrb[10].mxu1 }
 0x6e8   : > { %v2404_v55 = vadd.f32 %v2403_v47, %v2392_v14  ;;  %v2419_v41 = vrot.slane %v2417_v50, 4  ;;  %v2397_v56 = vpop.f32.mrb[11].mxu1  ;;  %v2514_v53 = vstv %s2513_s14 }
 0x6e9   : > { %v2410_v57 = vadd.f32 %v2409_v52, %v2394_v51  ;;  %v2425_v58 = vrot.slane %v2418_v40, 4  ;;  %vm2515_vm5 = vcmp.eq.s32.totalorder %v2514_v53, 1 }
 0x6ea   : > { %v2405_v61 = vrot.slane %v2404_v55, 2  ;;  %v2420_v62 = vadd.f32 %v2419_v41, %v2417_v50 }
 0x6eb   : > { %v2411_v63 = vrot.slane %v2410_v57, 2  ;;  %v2426_v0 = vadd.f32 %v2425_v58, %v2418_v40 }
 0x6ec   : > { %v2406_v1 = vadd.f32 %v2405_v61, %v2404_v55  ;;  %v2421_v2 = vrot.slane %v2420_v62, 2 }
 0x6ed   : > { %v2412_v3 = vadd.f32 %v2411_v63, %v2410_v57  ;;  %v2427_v4 = vrot.slane %v2426_v0, 2 }
 0x6ee   : > { %v2407_v5 = vrot.slane %v2406_v1, 1  ;;  %v2422_v7 = vadd.f32 %v2421_v2, %v2420_v62 }
 0x6ef   : > { %v2413_v8 = vrot.slane %v2412_v3, 1  ;;  %v2428_v10 = vadd.f32 %v2427_v4, %v2426_v0 }
 0x6f0   : > { %v2408_v13 = vadd.f32 %v2407_v5, %v2406_v1  ;;  %v2423_v15 = vrot.slane %v2422_v7, 1 }
 0x6f1   : > { %v2414_v17 = vadd.f32 %v2413_v8, %v2412_v3  ;;  %v2429_v6 = vrot.slane %v2428_v10, 1 }
 0x6f2   : > { %v2415_v18 = vmul.f32 0.125, %v2408_v13  ;;  %v2424_v19 = vadd.f32 %v2423_v15, %v2422_v7 }
 0x6f3   : > { %v2416_v20 = vmul.f32 0.125, %v2414_v17  ;;  %v2430_v21 = vadd.f32 %v2429_v6, %v2428_v10 }
 0x6f4   : > { %v2431_v9 = vmul.f32 0.125, %v2424_v19  ;;  %v2433_v24 = vmul.f32 %v2415_v18, %v2415_v18 }
 0x6f5   : > { %v2432_v16 = vmul.f32 0.125, %v2430_v21  ;;  %v2434_v37 = vmul.f32 %v2416_v20, %v2416_v20 }
 0x6f6   : > { %v2435_v22 = vsub.f32 %v2431_v9, %v2433_v24 }
 0x6f7   : > { %v2436_v28 = vsub.f32 %v2432_v16, %v2434_v37 }
 0x6f8   : > { %v2437_v29 = vadd.f32 1e-05, %v2435_v22 }
 0x6f9   : > { %v2438_v23 = vadd.f32 1e-05, %v2436_v28 }
 0x6fa   : > { %3995 = vrsqrt.f32 %v2437_v29 }
 0x6fb   : > { %3997 = vrsqrt.f32 %v2438_v23 }
 0x704   : > { %v3996_v27 = vpop.eup %3995 }
 0x705   : > { %v3998_v30 = vpop.eup %3997 }
 0x706   : > { %v2443_v33 = vcombine.low %v3996_v27, %v3998_v30 }
 0x708   : > { %v2450_v25 = vrot.slane %v2443_v33, %v4460_v54 }
 0x70a   : > { %v2452_v36 = vmul.f32 %v3453_v35, %v2450_v25 }
 0x70c   : > { %v2457_v38 = vrot.slane %v2452_v36, %v4466_v59  ;;  %v2461_v26 = vrot.slane %v2452_v36, %v4468_v60 }
 0x70e   : > { %v2471_v34 = vrot.slane %v2461_v26, %v4466_v59  ;;  %v2474_v39 = vmul.f32 %v2457_v38, %v2415_v18  ;;  %v2475_v42 = vmul.f32 %v2461_v26, %v2416_v20  ;;  %v2467_v44 = vrot.slane %v2457_v38, %v4466_v59 }
 0x710   : > { %v2473_v31 = vmul.f32 %v2471_v34, %v2394_v51  ;;  %v2478_v45 = vcombine.low %v2474_v39, %v2475_v42  ;;  %v2472_v46 = vmul.f32 %v2467_v44, %v2392_v14 }
 0x712   : > { %v2485_v32 = vrot.slane %v2478_v45, %v4460_v54 }
 0x714   : > { %v2486_v43 = vrot.slane %v2485_v32, 7 }
 0x716   : > { %v2488_v47 = vsub.f32 %v3453_v35, %v2486_v43 }
 0x718   : > { %v2497_v50 = vrot.slane %v2488_v47, %v4482_v12  ;;  %v2493_v52 = vrot.slane %v2488_v47, %v4480_v11 }
 0x71a   : > { %v2507_v40 = vrot.slane %v2497_v50, %v4480_v11  ;;  %v2503_v55 = vrot.slane %v2493_v52, %v4480_v11 }
 0x71c   : > { %v2509_v41 = vadd.f32 %v2507_v40, %v2473_v31  ;;  %v2508_v56 = vadd.f32 %v2503_v55, %v2472_v46 }
 0x71e   : > { %v2511_v51 = vmax.f32 %v2509_v41, 0.0  ;;  %v2510_v14 = vmax.f32 %v2508_v56, 0.0 }
 0x720   : > { %v4786_v57 = vsel %vm2515_vm5, %v2511_v51, %v4727_v48  ;;  %v4789_v58 = vsel %vm2515_vm5, %v2510_v14, %v4730_v49 }
 0x721   : > { %v2581_v61 = vpack.c.bf16 %v4786_v57, %v4786_v57  ;;  %v2518_v62 = vadd.f32 %v4786_v57, %v4789_v58  ;;  %v2580_v63 = vpack.c.bf16 %v4789_v58, %v4789_v58 }
 0x723   : > { %2774 = vmatprep.mubr.bf16.mxu0 %v2581_v61  ;;  %2519 = vadd.xlane.f32.xlu0 %v2518_v62 }
 0x724   : > { %2775 = vmatmul.mubr.bf16.vlgmr.msra.gmra.mrb[12].mxu0 %v2580_v63 }
 0x773   : > { %v2152_v0 = vpop.xlane.xlu1 %2151 }
 0x774   : > { %v2153_v1 = vrot.slane %v2152_v0, 4 }
 0x776   : > { %v2154_v48 = vadd.f32 %v2153_v1, %v2152_v0 }
 0x778   : > { %v2155_v2 = vrot.slane %v2154_v48, 2 }
 0x77a   : > { %v2156_v3 = vadd.f32 %v2155_v2, %v2154_v48 }
 0x77c   : > { %v2157_v4 = vrot.slane %v2156_v3, 1 }
 0x77e   : > { %v2158_v49 = vadd.f32 %v2157_v4, %v2156_v3 }
 0x780   : > { %3550 = vpush %v2158_v49  ;;  %v3519_v49 = vld [vmem:[%s4462_s26 + $0x18] sm:$0xf]  ;;  %s2897_s26 = scalar_select %p2896_p0, 1, 0 }
 0x7b0   : > { %v2520_v5 = vpop.xlane.xlu0 %2519 }
 0x7b1   : > { %v2521_v7 = vrot.slane %v2520_v5, 4  ;;  %s3551_s21 = spop %3550 }
 0x7b2   : > { %2161 = sst [smem:[%s3020_s15]] %s3551_s21 }
 0x7b3   : > { %v2522_v8 = vadd.f32 %v2521_v7, %v2520_v5 }
 0x7b5   : > { %v2523_v10 = vrot.slane %v2522_v8, 2 }
 0x7b7   : > { %v2524_v13 = vadd.f32 %v2523_v10, %v2522_v8 }
 0x7b9   : > { %v2525_v15 = vrot.slane %v2524_v13, 1 }
 0x7bb   : > { %v2526_v17 = vadd.f32 %v2525_v15, %v2524_v13 }
 0x7bd   : > { %3552 = vpush %v2526_v17 }
 0x7ee   : > { %s3553_s22 = spop %3552 }
 0x7ef   : > { %s2528_s5 = smul.f32 0.00048828125, %s3553_s22 }
 0x7f1   : > { %v2529_v6 = vstv %s2528_s5 }
 0x7f2   : > { %v2530_v18 = vsub.f32 %v4789_v58, %v2529_v6  ;;  %v2531_v19 = vsub.f32 %v4786_v57, %v2529_v6 }
 0x7f4   : > { %v2532_v20 = vmul.f32 %v2530_v18, %v2530_v18  ;;  %v2533_v21 = vmul.f32 %v2531_v19, %v2531_v19 }
 0x7f6   : > { %v2534_v9 = vadd.f32 %v2533_v21, %v2532_v20 }
 0x7f7   : > { %v2776_v24 = vpop.f32.mrb[12].mxu0 }
 0x7f8   : > { %v2787_v16 = vrot.slane %v2776_v24, 4  ;;  %v2801_v37 = vmul.f32 %v2776_v24, %v2776_v24  ;;  %2535 = vadd.xlane.f32.xlu1 %v2534_v9  ;;  %v2778_v22 = vpop.f32.mrb[13].mxu0 }
 0x7f9   : > { %v2793_v28 = vrot.slane %v2778_v22, 4  ;;  %v2802_v29 = vmul.f32 %v2778_v22, %v2778_v22  ;;  %v2780_v23 = vpop.f32.mrb[14].mxu0 }
 0x7fa   : > { %v2788_v27 = vadd.f32 %v2787_v16, %v2776_v24  ;;  %v2803_v30 = vrot.slane %v2801_v37, 4  ;;  %v2781_v33 = vpop.f32.mrb[15].mxu0  ;;  %v2898_v23 = vstv %s2897_s26 }
 0x7fb   : > { %v2794_v35 = vadd.f32 %v2793_v28, %v2778_v22  ;;  %v2809_v25 = vrot.slane %v2802_v29, 4  ;;  %vm2899_vm6 = vcmp.eq.s32.totalorder %v2898_v23, 1 }
 0x7fc   : > { %v2789_v36 = vrot.slane %v2788_v27, 2  ;;  %v2804_v38 = vadd.f32 %v2803_v30, %v2801_v37 }
 0x7fd   : > { %v2795_v26 = vrot.slane %v2794_v35, 2  ;;  %v2810_v34 = vadd.f32 %v2809_v25, %v2802_v29 }
 0x7fe   : > { %v2790_v39 = vadd.f32 %v2789_v36, %v2788_v27  ;;  %v2805_v42 = vrot.slane %v2804_v38, 2 }
 0x7ff   : > { %v2796_v44 = vadd.f32 %v2795_v26, %v2794_v35  ;;  %v2811_v31 = vrot.slane %v2810_v34, 2 }
 0x800   : > { %v2791_v45 = vrot.slane %v2790_v39, 1  ;;  %v2806_v46 = vadd.f32 %v2805_v42, %v2804_v38 }
 0x801   : > { %v2797_v32 = vrot.slane %v2796_v44, 1  ;;  %v2812_v43 = vadd.f32 %v2811_v31, %v2810_v34 }
 0x802   : > { %v2792_v47 = vadd.f32 %v2791_v45, %v2790_v39  ;;  %v2807_v50 = vrot.slane %v2806_v46, 1 }
 0x803   : > { %v2798_v52 = vadd.f32 %v2797_v32, %v2796_v44  ;;  %v2813_v40 = vrot.slane %v2812_v43, 1 }
 0x804   : > { %v2799_v53 = vmul.f32 0.125, %v2792_v47  ;;  %v2808_v55 = vadd.f32 %v2807_v50, %v2806_v46 }
 0x805   : > { %v2800_v41 = vmul.f32 0.125, %v2798_v52  ;;  %v2814_v56 = vadd.f32 %v2813_v40, %v2812_v43 }
 0x806   : > { %v2815_v51 = vmul.f32 0.125, %v2808_v55  ;;  %v2817_v14 = vmul.f32 %v2799_v53, %v2799_v53 }
 0x807   : > { %v2816_v61 = vmul.f32 0.125, %v2814_v56  ;;  %v2818_v62 = vmul.f32 %v2800_v41, %v2800_v41 }
 0x808   : > { %v2819_v63 = vsub.f32 %v2815_v51, %v2817_v14 }
 0x809   : > { %v2820_v0 = vsub.f32 %v2816_v61, %v2818_v62 }
 0x80a   : > { %v2821_v1 = vadd.f32 1e-05, %v2819_v63 }
 0x80b   : > { %v2822_v48 = vadd.f32 1e-05, %v2820_v0 }
 0x80c   : > { %3999 = vrsqrt.f32 %v2821_v1 }
 0x80d   : > { %4001 = vrsqrt.f32 %v2822_v48 }
 0x816   : > { %v4000_v2 = vpop.eup %3999 }
 0x817   : > { %v4002_v3 = vpop.eup %4001 }
 0x818   : > { %v2827_v4 = vcombine.low %v4000_v2, %v4002_v3 }
 0x81a   : > { %v2834_v5 = vrot.slane %v2827_v4, %v4460_v54 }
 0x81c   : > { %v2836_v7 = vmul.f32 %v3519_v49, %v2834_v5 }
 0x81e   : > { %v2841_v8 = vrot.slane %v2836_v7, %v4466_v59  ;;  %v2845_v10 = vrot.slane %v2836_v7, %v4468_v60 }
 0x820   : > { %v2855_v13 = vrot.slane %v2845_v10, %v4466_v59  ;;  %v2858_v15 = vmul.f32 %v2841_v8, %v2799_v53  ;;  %v2859_v17 = vmul.f32 %v2845_v10, %v2800_v41  ;;  %v2851_v6 = vrot.slane %v2841_v8, %v4466_v59 }
 0x822   : > { %v2857_v18 = vmul.f32 %v2855_v13, %v2778_v22  ;;  %v2862_v19 = vcombine.low %v2858_v15, %v2859_v17  ;;  %v2856_v20 = vmul.f32 %v2851_v6, %v2776_v24 }
 0x824   : > { %v2869_v21 = vrot.slane %v2862_v19, %v4460_v54 }
 0x826   : > { %v2870_v9 = vrot.slane %v2869_v21, 7 }
 0x828   : > { %v2872_v16 = vsub.f32 %v3519_v49, %v2870_v9 }
 0x82a   : > { %v2881_v37 = vrot.slane %v2872_v16, %v4482_v12  ;;  %v2877_v60 = vrot.slane %v2872_v16, %v4480_v11 }
 0x82c   : > { %v2891_v28 = vrot.slane %v2881_v37, %v4480_v11  ;;  %v2887_v29 = vrot.slane %v2877_v60, %v4480_v11 }
 0x82e   : > { %v2893_v59 = vadd.f32 %v2891_v28, %v2857_v18  ;;  %v2892_v27 = vadd.f32 %v2887_v29, %v2856_v20 }
 0x830   : > { %v2894_v22 = vmax.f32 %v2892_v27, 0.0  ;;  %v2895_v24 = vmax.f32 %v2893_v59, 0.0 }
 0x832   : > { %v2900_v54 = vsel %vm2899_vm6, %v2894_v22, %v4789_v58  ;;  %v2901_v30 = vsel %vm2899_vm6, %v2895_v24, %v4786_v57 }
 0x833   : > { %v2902_v33 = vadd.f32 %v2901_v30, %v2900_v54  ;;  %2930 = vst [vmem:[#allocation9] sm:$0xff] %v2900_v54  ;;  %2931 = vst [vmem:[#allocation9 + $0x8] sm:$0xff] %v2901_v30 }
 0x835   : > { %2903 = vadd.xlane.f32.xlu0 %v2902_v33 }
 0x885   : > { %v2536_v12 = vpop.xlane.xlu1 %2535 }
 0x886   : > { %v2537_v35 = vrot.slane %v2536_v12, 4 }
 0x888   : > { %v2538_v25 = vadd.f32 %v2537_v35, %v2536_v12 }
 0x88a   : > { %v2539_v36 = vrot.slane %v2538_v25, 2 }
 0x88c   : > { %v2540_v11 = vadd.f32 %v2539_v36, %v2538_v25 }
 0x88e   : > { %v2541_v38 = vrot.slane %v2540_v11, 1 }
 0x890   : > { %v2542_v26 = vadd.f32 %v2541_v38, %v2540_v11 }
 0x892   : > { %3554 = vpush %v2542_v26 }
 0x8c2   : > { %v2904_v34 = vpop.xlane.xlu0 %2903 }
 0x8c3   : > { %v2905_v39 = vrot.slane %v2904_v34, 4  ;;  %s3555_s9 = spop %3554 }
 0x8c4   : > { %2545 = sst [smem:[%s3027_s30]] %s3555_s9 }
 0x8c5   : > { %v2906_v58 = vadd.f32 %v2905_v39, %v2904_v34 }
 0x8c7   : > { %v2907_v57 = vrot.slane %v2906_v58, 2 }
 0x8c9   : > { %v2908_v42 = vadd.f32 %v2907_v57, %v2906_v58 }
 0x8cb   : > { %v2909_v44 = vrot.slane %v2908_v42, 1 }
 0x8cd   : > { %v2910_v31 = vadd.f32 %v2909_v44, %v2908_v42 }
 0x8cf   : > { %3556 = vpush %v2910_v31 }
 0x900   : > { %s3557_s25 = spop %3556 }
 0x901   : > { %s2912_s6 = smul.f32 0.00048828125, %s3557_s25 }
 0x903   : > { %v2913_v45 = vstv %s2912_s6 }
 0x904   : > { %v2914_v46 = vsub.f32 %v2900_v54, %v2913_v45  ;;  %v2915_v32 = vsub.f32 %v2901_v30, %v2913_v45 }
 0x906   : > { %v2916_v43 = vmul.f32 %v2914_v46, %v2914_v46  ;;  %v2917_v47 = vmul.f32 %v2915_v32, %v2915_v32 }
 0x908   : > { %v2918_v50 = vadd.f32 %v2917_v47, %v2916_v43 }
 0x90a   : > { %2919 = vadd.xlane.f32.xlu1 %v2918_v50 }
 0x90b   : > { %4102 = shalt.err (!%p4099_p7)
}
 0x90c   : > { %s4103_s27 = scalar_lea.hbm %s4875_s3, 256 }
 0x90d   : > { %p4104_p11 = scmp.ne.s32.totalorder %s4875_s3, %s4103_s27  ;;  %p4109_p8 = scmp.lt.u32.totalorder %s4103_s27, %s4875_s3 }
 0x90f   : > { %p4105_p13 = pnand %p4104_p11, %p3594_p5 }
 0x911   : > { %p4106_p12 = pneg %p4105_p13 }
 0x913   : > { %p4111_p10 = pnand %p4109_p8, %p4106_p12 }
 0x915   : > { %4114 = shalt.err (!%p4111_p10)
}
 0x916   : > { %3571 = dma.vmem_to_hbm [thread:$0]  (%p3594_p5), %s2940_s8, 256, %s4875_s3, [#allocation4]  }
 0x917   : > { %s3034_s22 = scalar_lea.smem %s4591_s28, 6 [#allocation10]  ;;  %s4115_s30 = scalar_lea.hbm %s4876_s4, 16 }
 0x918   : > { %p4116_p0 = scmp.ne.s32.totalorder %s4876_s4, %s4115_s30  ;;  %p4121_p3 = scmp.lt.u32.totalorder %s4115_s30, %s4876_s4 }
 0x91a   : > { %p4117_p9 = pnand %p4116_p0, %p3594_p5 }
 0x91c   : > { %p4118_p1 = pneg %p4117_p9 }
 0x91e   : > { %p4123_p2 = pnand %p4121_p3, %p4118_p1 }
 0x997   : > { %v2920_v52 = vpop.xlane.xlu1 %2919 }
 0x998   : > { %v2921_v40 = vrot.slane %v2920_v52, 4 }
 0x99a   : > { %v2922_v53 = vadd.f32 %v2921_v40, %v2920_v52 }
 0x99c   : > { %v2923_v55 = vrot.slane %v2922_v53, 2 }
 0x99e   : > { %v2924_v41 = vadd.f32 %v2923_v55, %v2922_v53 }
 0x9a0   : > { %v2925_v56 = vrot.slane %v2924_v41, 1 }
 0x9a2   : > { %v2926_v51 = vadd.f32 %v2925_v56, %v2924_v41 }
 0x9a4   : > { %3558 = vpush %v2926_v51 }
 0x9d5   : > { %s3559_s5 = spop %3558 }
 0x9d6   : > { %2929 = sst [smem:[%s3034_s22]] %s3559_s5 }
 0x9d7   : > { %4126 = shalt.err (!%p4123_p2)
}
 0x9d8   : > { %s4188_s28 = smov [#allocation10]  }
 0x9d9   : > { %3573 = dma.smem_to_hbm (%p3594_p5), %s4188_s28, 16, %s4876_s4, [#allocation5]  }
 0x9da   : > { %4156 = dma.done.wait (%p3594_p5), [#allocation4], 256  }
 0x9db   : > { %4158 = vsyncadd (%p3594_p5), [#allocation4], 4294967040 }
 0x9dc   : > { %4160 = dma.done.wait (%p3594_p5), [#allocation5], 16  }
 0x9dd   : > { %4162 = vsyncadd (%p3594_p5), [#allocation5], 4294967280 }
 0x9de   : > { %2960 = sfence }
 0x9df PF: > { %p18_p6 = scmp.ge.s32.totalorder %s4236_s20, 4   ;;  %s4894_s15 = smov %s4169_s16 }
 0x9e0   : > { %s4895_s16 = smov %s4173_s17  ;;  %s4896_s17 = smov %s4246_s23 }
 0x9e1   : > { %s4897_s18 = smov %s4236_s20  ;;  %20 = sbr.rel (!%p18_p6) target bundleno = 6 (0x6), region = 111 }
 0x9e8   :  { %2966 = vsyncpa [#allocation3], 1 }
 0x9e9   :  { %2968 = vsyncpa [#allocation3 + $0x1], 1 }
 0x9ea   :  { %2969 = vsyncpa [#allocation7], 1 }
 0x9eb   :  { %2971 = vsyncpa [#allocation7 + $0x1], 1 }
 0x9ec   :  { %2972 = vsyncpa [#allocation4], 1 }
 0x9ed   :  { %2974 = vsyncpa [#allocation4 + $0x1], 1 }
 0x9ee   :  { %2975 = vsyncpa [#allocation5], 1 }
 0x9ef   :  { %2977 = vsyncpa [#allocation5 + $0x1], 1 }

</bundles_post_ra>
